<compile_context>
chip_gen: v7x
topology: tpu7x:2x2x1
jax: 0.10.0
libtpu: 0.0.40
codegen_flags: <defaults>
</compile_context>

<pallas_src>
import functools

import jax
import jax.numpy as jnp
from jax import lax
from jax.experimental import pallas as pl
from jax.experimental.pallas import tpu as pltpu

LN_EPS = 1e-5
# Raise v5e's 16 MiB default scoped-VMEM limit; equal to the v6e/v7x defaults (safe everywhere).
VMEM_LIMIT_BYTES = 32 * 1024 * 1024


# ----------------------------- in-kernel helpers -----------------------------

def _gelu(x):
    # TODO(synk): PyTorch nn.GELU defaults to exact erf; tanh approximation is used here for
    # guaranteed Mosaic EUP lowering.
    return 0.5 * x * (1.0 + jnp.tanh(0.7978845608028654 * (x + 0.044715 * x * x * x)))


def _layernorm(v, g, b):
    mu = jnp.mean(v, axis=-1, keepdims=True)
    var = jnp.mean((v - mu) ** 2, axis=-1, keepdims=True)
    return (v - mu) * lax.rsqrt(var + LN_EPS) * g + b


def _bf16(x):
    return x.astype(jnp.bfloat16)


# -------------------------------- Pallas kernels ------------------------------

def tokenizer_matmul_kernel(x_ref, w_ref, b_ref, o_ref):
    # (TM, K)bf16 @ (K, D)bf16 -> f32 accum, + (1, D)f32 bias
    o_ref[...] = (jnp.dot(x_ref[...], w_ref[...],
                          preferred_element_type=jnp.float32) + b_ref[...])


def encoder_layer_kernel(x_ref, ln1g_ref, ln1b_ref, wqkv_ref, bqkv_ref,
                         wo_ref, bo_ref, ln2g_ref, ln2b_ref,
                         w1_ref, b1_ref, w2_ref, b2_ref, o_ref,
                         *, num_heads, scale):
    # One batch element per grid step; all weights resident across the grid.
    x = x_ref[0]                                              # (T, D) f32 residual stream
    D = x.shape[-1]
    hd = D // num_heads

    # ---- multi-head self-attention (pre-norm) ----
    h = _layernorm(x, ln1g_ref[...], ln1b_ref[...])
    # One big QKV matmul (T, D) @ (D, 3D); column layout is [q | k | v], head-major inside each.
    qkv = jnp.dot(_bf16(h), wqkv_ref[...],
                  preferred_element_type=jnp.float32) + bqkv_ref[...]       # (T, 3D) f32
    head_outs = []
    for hh in range(num_heads):                                # static unroll over heads
        q = qkv[:, hh * hd:(hh + 1) * hd]
        k = qkv[:, D + hh * hd: D + (hh + 1) * hd]
        v = qkv[:, 2 * D + hh * hd: 2 * D + (hh + 1) * hd]
        # scores = q @ k^T  (contract last dims; no materialized transpose)
        s = lax.dot_general(_bf16(q), _bf16(k), (((1,), (1,)), ((), ())),
                            preferred_element_type=jnp.float32) * scale     # (T, T)
        s = s - jnp.max(s, axis=-1, keepdims=True)
        p = jnp.exp(s)
        p = p * pl.reciprocal(jnp.sum(p, axis=-1, keepdims=True), approx=True)
        head_outs.append(jnp.dot(_bf16(p), _bf16(v),
                                 preferred_element_type=jnp.float32))        # (T, hd)
    attn = jnp.concatenate(head_outs, axis=-1)                 # (T, D) merged heads (in VMEM)

    # attention output projection + residual (dropout / stochastic depth are eval no-ops)
    y = x + jnp.dot(_bf16(attn), wo_ref[...],
                    preferred_element_type=jnp.float32) + bo_ref[...]

    # ---- MLP (pre-norm) + residual ----
    h2 = _layernorm(y, ln2g_ref[...], ln2b_ref[...])
    m = jnp.dot(_bf16(h2), w1_ref[...],
                preferred_element_type=jnp.float32) + b1_ref[...]
    m = _gelu(m)
    out = y + jnp.dot(_bf16(m), w2_ref[...],
                      preferred_element_type=jnp.float32) + b2_ref[...]
    o_ref[...] = out.reshape(o_ref.shape)


def head_kernel(x_ref, lng_ref, lnb_ref, wpool_ref, bpool_ref, wfc_ref, bfc_ref, o_ref):
    # One batch element per grid step.  Output lane dim is padded to a multiple of 128.
    xx = _layernorm(x_ref[0], lng_ref[...], lnb_ref[...])                    # (T, D)
    # sequence (attention) pooling: Linear(D, 1) -> softmax over T -> weighted sum
    a = jnp.sum(xx * wpool_ref[...], axis=-1, keepdims=True) + bpool_ref[...]  # (T, 1)
    a = a - jnp.max(a, axis=0, keepdims=True)
    a = jnp.exp(a)
    a = a * pl.reciprocal(jnp.sum(a, axis=0, keepdims=True), approx=True)
    pooled = jnp.sum(a * xx, axis=0, keepdims=True)                          # (1, D)
    logits = jnp.dot(_bf16(pooled), wfc_ref[...],
                     preferred_element_type=jnp.float32) + bfc_ref[...]      # (1, NCP)
    o_ref[...] = logits.reshape(o_ref.shape)


# ----------------------------------- wrappers ---------------------------------

def tokenize(x_img, w_tok_bf16, b_tok, width_patches):
    B, C, H, W = x_img.shape
    S = W // width_patches
    K = C * H * width_patches
    D = w_tok_bf16.shape[-1]
    # vertical strips flattened in (C, H, wp) order (matches Conv2d weight layout)
    patches = (x_img.reshape(B, C, H, S, width_patches)
               .transpose(0, 3, 1, 2, 4)
               .reshape(B * S, K)).astype(jnp.bfloat16)
    M = B * S
    TM = min(256, M)                       # big row tile feeds the MXU / amortizes step overhead
    Mp = ((M + TM - 1) // TM) * TM
    if Mp != M:
        patches = jnp.pad(patches, ((0, Mp - M), (0, 0)))
    out = pl.pallas_call(
        tokenizer_matmul_kernel,
        out_shape=jax.ShapeDtypeStruct((Mp, D), jnp.float32),
        grid=(Mp // TM,),
        in_specs=[pl.BlockSpec((TM, K), lambda i: (i, 0)),
                  pl.BlockSpec((K, D), lambda i: (0, 0)),
                  pl.BlockSpec((1, D), lambda i: (0, 0))],
        out_specs=pl.BlockSpec((TM, D), lambda i: (i, 0)),
        compiler_params=pltpu.CompilerParams(
            dimension_semantics=("parallel",),
            vmem_limit_bytes=VMEM_LIMIT_BYTES),
    )(patches, w_tok_bf16, b_tok)
    return out[:M].reshape(B, S, D)


def encoder_layer(x, lp, num_heads):
    B, T, D = x.shape
    hd = D // num_heads
    hidden = lp['w_mlp1'].shape[-1]
    return pl.pallas_call(
        functools.partial(encoder_layer_kernel,
                          num_heads=num_heads, scale=float(hd) ** -0.5),
        out_shape=jax.ShapeDtypeStruct((B, T, D), jnp.float32),
        grid=(B,),
        in_specs=[
            pl.BlockSpec((1, T, D), lambda b: (b, 0, 0)),           # residual stream
            pl.BlockSpec((1, D), lambda b: (0, 0)),                 # ln1 gamma
            pl.BlockSpec((1, D), lambda b: (0, 0)),                 # ln1 beta
            pl.BlockSpec((D, 3 * D), lambda b: (0, 0)),             # Wqkv (bf16)
            pl.BlockSpec((1, 3 * D), lambda b: (0, 0)),             # bqkv (f32)
            pl.BlockSpec((D, D), lambda b: (0, 0)),                 # Wo (bf16)
            pl.BlockSpec((1, D), lambda b: (0, 0)),                 # bo
            pl.BlockSpec((1, D), lambda b: (0, 0)),                 # ln2 gamma
            pl.BlockSpec((1, D), lambda b: (0, 0)),                 # ln2 beta
            pl.BlockSpec((D, hidden), lambda b: (0, 0)),            # W1 (bf16)
            pl.BlockSpec((1, hidden), lambda b: (0, 0)),            # b1
            pl.BlockSpec((hidden, D), lambda b: (0, 0)),            # W2 (bf16)
            pl.BlockSpec((1, D), lambda b: (0, 0)),                 # b2
        ],
        out_specs=pl.BlockSpec((1, T, D), lambda b: (b, 0, 0)),
        compiler_params=pltpu.CompilerParams(
            dimension_semantics=("parallel",),
            vmem_limit_bytes=VMEM_LIMIT_BYTES),
    )(x, lp['ln1_g'], lp['ln1_b'], lp['w_qkv'], lp['b_qkv'],
      lp['w_o'], lp['b_o'], lp['ln2_g'], lp['ln2_b'],
      lp['w_mlp1'], lp['b_mlp1'], lp['w_mlp2'], lp['b_mlp2'])


def classifier_head(x, pp):
    B, T, D = x.shape
    ncp = pp['w_fc'].shape[-1]
    out = pl.pallas_call(
        head_kernel,
        out_shape=jax.ShapeDtypeStruct((B, 1, ncp), jnp.float32),
        grid=(B,),
        in_specs=[
            pl.BlockSpec((1, T, D), lambda b: (b, 0, 0)),
            pl.BlockSpec((1, D), lambda b: (0, 0)),
            pl.BlockSpec((1, D), lambda b: (0, 0)),
            pl.BlockSpec((1, D), lambda b: (0, 0)),
            pl.BlockSpec((1, 1), lambda b: (0, 0)),
            pl.BlockSpec((D, ncp), lambda b: (0, 0)),
            pl.BlockSpec((1, ncp), lambda b: (0, 0)),
        ],
        out_specs=pl.BlockSpec((1, 1, ncp), lambda b: (b, 0, 0)),
        compiler_params=pltpu.CompilerParams(
            dimension_semantics=("parallel",),
            vmem_limit_bytes=VMEM_LIMIT_BYTES),
    )(x, pp['ln_g'], pp['ln_b'], pp['w_pool'], pp['b_pool'], pp['w_fc'], pp['b_fc'])
    return out.reshape(B, ncp)[:, :pp['num_classes']]


# ------------------------- parameter preparation (glue) -------------------------

def prepare_params(params, num_heads):
    """Cast matmul weights to bf16, flatten biases, pad classifier lanes."""
    D = params['w_tok'].shape[-1]
    nc = params['w_fc'].shape[-1]
    ncp = ((nc + 127) // 128) * 128              # lane-dense logits store
    pp = {
        'w_tok': params['w_tok'].astype(jnp.bfloat16),
        'b_tok': params['b_tok'].reshape(1, D),
        'ln_g': params['ln_g'].reshape(1, D),
        'ln_b': params['ln_b'].reshape(1, D),
        'w_pool': params['w_pool'].reshape(1, D),
        'b_pool': params['b_pool'].reshape(1, 1),
        'w_fc': jnp.zeros((D, ncp), jnp.bfloat16).at[:, :nc].set(
            params['w_fc'].astype(jnp.bfloat16)),
        'b_fc': jnp.zeros((1, ncp), jnp.float32).at[:, :nc].set(
            params['b_fc'].reshape(1, nc)),
        'num_classes': nc,
        'layers': [],
    }
    for lp in params['layers']:
        pp['layers'].append({
            'ln1_g': lp['ln1_g'].reshape(1, D),
            'ln1_b': lp['ln1_b'].reshape(1, D),
            'w_qkv': lp['w_qkv'].astype(jnp.bfloat16),          # (D, 3D), [q|k|v] head-major
            'b_qkv': lp['b_qkv'].reshape(1, 3 * D).astype(jnp.float32),
            'w_o': lp['w_o'].astype(jnp.bfloat16),
            'b_o': lp['b_o'].reshape(1, D),
            'ln2_g': lp['ln2_g'].reshape(1, D),
            'ln2_b': lp['ln2_b'].reshape(1, D),
            'w_mlp1': lp['w_mlp1'].astype(jnp.bfloat16),
            'b_mlp1': lp['b_mlp1'].reshape(1, -1),
            'w_mlp2': lp['w_mlp2'].astype(jnp.bfloat16),
            'b_mlp2': lp['b_mlp2'].reshape(1, D),
        })
    return pp


def memory_cvt_forward(x_img, params, *, width_patches, num_heads):
    pp = prepare_params(params, num_heads)
    tok = tokenize(x_img, pp['w_tok'], pp['b_tok'], width_patches)       # (B, S, D)
    B = tok.shape[0]
    mem = jnp.broadcast_to(params['memory_token'],
                           (B,) + params['memory_token'].shape[1:])
    seq = jnp.concatenate([mem, tok], axis=1) + params['pos_emb']        # (B, T, D)
    # TODO(synk): dropout / attention_dropout / stochastic_depth are inference-mode no-ops.
    # TODO(synk): for long sequences, tile attention over KV blocks (online softmax) and
    #             prefetch the next layer's weights behind the current layer's compute.
    for lp in pp['layers']:
        seq = encoder_layer(seq, lp, num_heads)
    return classifier_head(seq, pp)


# ------------------------------ parameter setup -------------------------------

def init_params(key, *, img_size, n_input_channels, width_patches, embedding_dim,
                num_layers, num_heads, mlp_ratio, num_classes, n_memory_tokens=1):
    D = embedding_dim
    assert D % num_heads == 0
    K = n_input_channels * img_size * width_patches
    S = img_size // width_patches
    T = S + n_memory_tokens
    hidden = int(D * mlp_ratio)
    ks = jax.random.split(key, 6 + num_layers)

    def nrm(k, shape, scale=0.02):
        return (scale * jax.random.normal(k, shape)).astype(jnp.float32)

    params = {
        'w_tok': nrm(ks[0], (K, D)),
        'b_tok': jnp.zeros((1, D), jnp.float32),
        'memory_token': nrm(ks[1], (1, n_memory_tokens, D)),
        'pos_emb': nrm(ks[2], (1, T, D)),          # learnable positional embedding
        'ln_g': jnp.ones((1, 1, D), jnp.float32),
        'ln_b': jnp.zeros((1, 1, D), jnp.float32),
        'w_pool': nrm(ks[3], (1, 1, D)),
        'b_pool': jnp.zeros((1, 1, 1), jnp.float32),
        'w_fc': nrm(ks[4], (D, num_classes)),
        'b_fc': jnp.zeros((1, num_classes), jnp.float32),
        'layers': [],
    }
    for li in range(num_layers):
        lk = jax.random.split(ks[5 + li], 4)
        params['layers'].append({
            'ln1_g': jnp.ones((1, 1, D), jnp.float32),
            'ln1_b': jnp.zeros((1, 1, D), jnp.float32),
            'w_qkv': nrm(lk[0], (D, 3 * D)),
            'b_qkv': jnp.zeros((1, 1, 3 * D), jnp.float32),
            'w_o': nrm(lk[1], (D, D)),
            'b_o': jnp.zeros((1, 1, D), jnp.float32),
            'ln2_g': jnp.ones((1, 1, D), jnp.float32),
            'ln2_b': jnp.zeros((1, 1, D), jnp.float32),
            'w_mlp1': nrm(lk[2], (D, hidden)),
            'b_mlp1': jnp.zeros((1, 1, hidden), jnp.float32),
            'w_mlp2': nrm(lk[3], (hidden, D)),
            'b_mlp2': jnp.zeros((1, 1, D), jnp.float32),
        })
    return params


# ------------------------------------ main -------------------------------------

if __name__ == "__main__":
    # Small shapes consistent with MemoryCVT's constructor (img_size % width_patches == 0).
    img_size = 16
    n_input_channels = 3
    width_patches = 2
    embedding_dim = 32
    num_layers = 2
    num_heads = 4
    mlp_ratio = 2.0
    num_classes = 10
    batch = 2

    key = jax.random.PRNGKey(0)
    kx, kp = jax.random.split(key)
    x = jax.random.normal(kx, (batch, n_input_channels, img_size, img_size),
                          dtype=jnp.float32)
    params = init_params(kp,
                         img_size=img_size,
                         n_input_channels=n_input_channels,
                         width_patches=width_patches,
                         embedding_dim=embedding_dim,
                         num_layers=num_layers,
                         num_heads=num_heads,
                         mlp_ratio=mlp_ratio,
                         num_classes=num_classes)

    fwd = jax.jit(functools.partial(memory_cvt_forward,
                                    width_patches=width_patches,
                                    num_heads=num_heads))
    logits = fwd(x, params)
    logits = jax.block_until_ready(logits)
    assert logits.shape == (batch, num_classes), logits.shape
    assert bool(jnp.all(jnp.isfinite(logits)))
    print("KERNEL_OK")
</pallas_src>

<mosaic_0001>
module attributes {stable_mosaic.version = 11 : i64} {
  func.func @tokenizer_matmul_kernel(%arg0: i32, %arg1: memref<16x96xbf16, #tpu.memory_space<vmem>>, %arg2: memref<96x32xbf16, #tpu.memory_space<vmem>>, %arg3: memref<1x32xf32, #tpu.memory_space<vmem>>, %arg4: memref<16x32xf32, #tpu.memory_space<vmem>>) attributes {dimension_semantics = [#tpu.dimension_semantics<parallel>], iteration_bounds = array<i64: 1>, scalar_prefetch = 0 : i64, scratch_operands = 0 : i64, tpu.core_type = #tpu.core_type<tc>, window_params = [{transform_indices = @transform_0, window_bounds = array<i64: 16, 96>}, {pipeline_mode = #tpu.pipeline_mode<synchronous>, transform_indices = @transform_1, window_bounds = array<i64: 96, 32>}, {pipeline_mode = #tpu.pipeline_mode<synchronous>, transform_indices = @transform_2, window_bounds = array<i64: 1, 32>}, {transform_indices = @transform_3, window_bounds = array<i64: 16, 32>}]} {
    %c0 = arith.constant 0 : index
    %c0_0 = arith.constant 0 : index
    %0 = vector.load %arg1[%c0, %c0_0] : memref<16x96xbf16, #tpu.memory_space<vmem>>, vector<16x96xbf16>
    %c0_1 = arith.constant 0 : index
    %c0_2 = arith.constant 0 : index
    %1 = vector.load %arg2[%c0_1, %c0_2] : memref<96x32xbf16, #tpu.memory_space<vmem>>, vector<96x32xbf16>
    %cst = arith.constant dense<0.000000e+00> : vector<16x32xf32>
    %2 = tpu.matmul %0, %1, %cst {dimension_numbers = #tpu.dot_dimension_numbers<[1], [0], [0], [1], [0, 0, 1, 1], [], []>} : vector<16x96xbf16>, vector<96x32xbf16>, vector<16x32xf32> -> vector<16x32xf32>
    %c0_3 = arith.constant 0 : index
    %c0_4 = arith.constant 0 : index
    %3 = vector.load %arg3[%c0_3, %c0_4] : memref<1x32xf32, #tpu.memory_space<vmem>>, vector<1x32xf32>
    %4 = vector.broadcast %3 : vector<1x32xf32> to vector<16x32xf32>
    %5 = arith.addf %2, %4 : vector<16x32xf32>
    %c0_5 = arith.constant 0 : index
    %c0_6 = arith.constant 0 : index
    %6 = vector.load %arg4[%c0_5, %c0_6] : memref<16x32xf32, #tpu.memory_space<vmem>>, vector<16x32xf32>
    tpu.vector_store %arg4[%c0_5, %c0_6], %5 {strides = array<i32>} : memref<16x32xf32, #tpu.memory_space<vmem>>, vector<16x32xf32>,
    return
  }
  func.func @transform_0(%arg0: i32) -> (i32, i32) {
    %c0_i32 = arith.constant 0 : i32
    %c0_i32_0 = arith.constant 0 : i32
    return %arg0, %c0_i32 : i32, i32
  }
  func.func @transform_1(%arg0: i32) -> (i32, i32) {
    %c0_i32 = arith.constant 0 : i32
    %c0_i32_0 = arith.constant 0 : i32
    %c0_i32_1 = arith.constant 0 : i32
    return %c0_i32, %c0_i32_0 : i32, i32
  }
  func.func @transform_2(%arg0: i32) -> (i32, i32) {
    %c0_i32 = arith.constant 0 : i32
    %c0_i32_0 = arith.constant 0 : i32
    %c0_i32_1 = arith.constant 0 : i32
    return %c0_i32, %c0_i32_0 : i32, i32
  }
  func.func @transform_3(%arg0: i32) -> (i32, i32) {
    %c0_i32 = arith.constant 0 : i32
    %c0_i32_0 = arith.constant 0 : i32
    return %arg0, %c0_i32 : i32, i32
  }
}

module attributes {stable_mosaic.version = 11 : i64} {
  func.func @encoder_layer_kernel(%arg0: i32, %arg1: memref<1x9x32xf32, #tpu.memory_space<vmem>>, %arg2: memref<1x32xf32, #tpu.memory_space<vmem>>, %arg3: memref<1x32xf32, #tpu.memory_space<vmem>>, %arg4: memref<32x96xbf16, #tpu.memory_space<vmem>>, %arg5: memref<1x96xf32, #tpu.memory_space<vmem>>, %arg6: memref<32x32xbf16, #tpu.memory_space<vmem>>, %arg7: memref<1x32xf32, #tpu.memory_space<vmem>>, %arg8: memref<1x32xf32, #tpu.memory_space<vmem>>, %arg9: memref<1x32xf32, #tpu.memory_space<vmem>>, %arg10: memref<32x64xbf16, #tpu.memory_space<vmem>>, %arg11: memref<1x64xf32, #tpu.memory_space<vmem>>, %arg12: memref<64x32xbf16, #tpu.memory_space<vmem>>, %arg13: memref<1x32xf32, #tpu.memory_space<vmem>>, %arg14: memref<1x9x32xf32, #tpu.memory_space<vmem>>) attributes {dimension_semantics = [#tpu.dimension_semantics<parallel>], iteration_bounds = array<i64: 2>, scalar_prefetch = 0 : i64, scratch_operands = 0 : i64, tpu.core_type = #tpu.core_type<tc>, window_params = [{transform_indices = @transform_0, window_bounds = array<i64: 1, 9, 32>}, {pipeline_mode = #tpu.pipeline_mode<synchronous>, transform_indices = @transform_1, window_bounds = array<i64: 1, 32>}, {pipeline_mode = #tpu.pipeline_mode<synchronous>, transform_indices = @transform_2, window_bounds = array<i64: 1, 32>}, {pipeline_mode = #tpu.pipeline_mode<synchronous>, transform_indices = @transform_3, window_bounds = array<i64: 32, 96>}, {pipeline_mode = #tpu.pipeline_mode<synchronous>, transform_indices = @transform_4, window_bounds = array<i64: 1, 96>}, {pipeline_mode = #tpu.pipeline_mode<synchronous>, transform_indices = @transform_5, window_bounds = array<i64: 32, 32>}, {pipeline_mode = #tpu.pipeline_mode<synchronous>, transform_indices = @transform_6, window_bounds = array<i64: 1, 32>}, {pipeline_mode = #tpu.pipeline_mode<synchronous>, transform_indices = @transform_7, window_bounds = array<i64: 1, 32>}, {pipeline_mode = #tpu.pipeline_mode<synchronous>, transform_indices = @transform_8, window_bounds = array<i64: 1, 32>}, {pipeline_mode = #tpu.pipeline_mode<synchronous>, transform_indices = @transform_9, window_bounds = array<i64: 32, 64>}, {pipeline_mode = #tpu.pipeline_mode<synchronous>, transform_indices = @transform_10, window_bounds = array<i64: 1, 64>}, {pipeline_mode = #tpu.pipeline_mode<synchronous>, transform_indices = @transform_11, window_bounds = array<i64: 64, 32>}, {pipeline_mode = #tpu.pipeline_mode<synchronous>, transform_indices = @transform_12, window_bounds = array<i64: 1, 32>}, {transform_indices = @transform_13, window_bounds = array<i64: 1, 9, 32>}]} {
    %c0 = arith.constant 0 : index
    %c0_0 = arith.constant 0 : index
    %c0_1 = arith.constant 0 : index
    %0 = vector.load %arg1[%c0, %c0_0, %c0_1] : memref<1x9x32xf32, #tpu.memory_space<vmem>>, vector<1x9x32xf32>
    %1 = vector.shape_cast %0 : vector<1x9x32xf32> to vector<9x32xf32>
    %c0_2 = arith.constant 0 : index
    %c0_3 = arith.constant 0 : index
    %2 = vector.load %arg2[%c0_2, %c0_3] : memref<1x32xf32, #tpu.memory_space<vmem>>, vector<1x32xf32>
    %c0_4 = arith.constant 0 : index
    %c0_5 = arith.constant 0 : index
    %3 = vector.load %arg3[%c0_4, %c0_5] : memref<1x32xf32, #tpu.memory_space<vmem>>, vector<1x32xf32>
    %cst = arith.constant dense<0.000000e+00> : vector<9xf32>
    %4 = vector.multi_reduction <add>, %1, %cst [1] : vector<9x32xf32> to vector<9xf32>
    %5 = vector.shape_cast %4 : vector<9xf32> to vector<9x1xf32>
    %cst_6 = arith.constant 3.200000e+01 : f32
    %6 = vector.broadcast %cst_6 : f32 to vector<9x1xf32>
    %7 = arith.divf %5, %6 : vector<9x1xf32>
    %8 = vector.broadcast %7 : vector<9x1xf32> to vector<9x32xf32>
    %9 = arith.subf %1, %8 : vector<9x32xf32>
    %10 = arith.mulf %9, %9 : vector<9x32xf32>
    %cst_7 = arith.constant dense<0.000000e+00> : vector<9xf32>
    %11 = vector.multi_reduction <add>, %10, %cst_7 [1] : vector<9x32xf32> to vector<9xf32>
    %12 = vector.shape_cast %11 : vector<9xf32> to vector<9x1xf32>
    %cst_8 = arith.constant 3.200000e+01 : f32
    %13 = vector.broadcast %cst_8 : f32 to vector<9x1xf32>
    %14 = arith.divf %12, %13 : vector<9x1xf32>
    %15 = vector.broadcast %7 : vector<9x1xf32> to vector<9x32xf32>
    %16 = arith.subf %1, %15 : vector<9x32xf32>
    %cst_9 = arith.constant 9.99999974E-6 : f32
    %17 = vector.broadcast %cst_9 : f32 to vector<9x1xf32>
    %18 = arith.addf %14, %17 : vector<9x1xf32>
    %19 = math.rsqrt %18 : vector<9x1xf32>
    %20 = vector.broadcast %19 : vector<9x1xf32> to vector<9x32xf32>
    %21 = arith.mulf %16, %20 : vector<9x32xf32>
    %22 = vector.broadcast %2 : vector<1x32xf32> to vector<9x32xf32>
    %23 = arith.mulf %21, %22 : vector<9x32xf32>
    %24 = vector.broadcast %3 : vector<1x32xf32> to vector<9x32xf32>
    %25 = arith.addf %23, %24 : vector<9x32xf32>
    %26 = arith.truncf %25 : vector<9x32xf32> to vector<9x32xbf16>
    %c0_10 = arith.constant 0 : index
    %c0_11 = arith.constant 0 : index
    %27 = vector.load %arg4[%c0_10, %c0_11] : memref<32x96xbf16, #tpu.memory_space<vmem>>, vector<32x96xbf16>
    %cst_12 = arith.constant dense<0.000000e+00> : vector<9x96xf32>
    %28 = tpu.matmul %26, %27, %cst_12 {dimension_numbers = #tpu.dot_dimension_numbers<[1], [0], [0], [1], [0, 0, 1, 1], [], []>} : vector<9x32xbf16>, vector<32x96xbf16>, vector<9x96xf32> -> vector<9x96xf32>
    %c0_13 = arith.constant 0 : index
    %c0_14 = arith.constant 0 : index
    %29 = vector.load %arg5[%c0_13, %c0_14] : memref<1x96xf32, #tpu.memory_space<vmem>>, vector<1x96xf32>
    %30 = vector.broadcast %29 : vector<1x96xf32> to vector<9x96xf32>
    %31 = arith.addf %28, %30 : vector<9x96xf32>
    %32 = vector.extract_strided_slice %31 {offsets = [0, 0], sizes = [9, 8], strides = [1, 1]} : vector<9x96xf32> to vector<9x8xf32>
    %33 = vector.extract_strided_slice %31 {offsets = [0, 32], sizes = [9, 8], strides = [1, 1]} : vector<9x96xf32> to vector<9x8xf32>
    %34 = vector.extract_strided_slice %31 {offsets = [0, 64], sizes = [9, 8], strides = [1, 1]} : vector<9x96xf32> to vector<9x8xf32>
    %35 = arith.truncf %32 : vector<9x8xf32> to vector<9x8xbf16>
    %36 = arith.truncf %33 : vector<9x8xf32> to vector<9x8xbf16>
    %cst_15 = arith.constant dense<0.000000e+00> : vector<9x9xf32>
    %37 = tpu.matmul %35, %36, %cst_15 {dimension_numbers = #tpu.dot_dimension_numbers<[1], [1], [0], [0], [0, 0, 1, 0], [], []>} : vector<9x8xbf16>, vector<9x8xbf16>, vector<9x9xf32> -> vector<9x9xf32>
    %cst_16 = arith.constant 0.353553385 : f32
    %38 = vector.broadcast %cst_16 : f32 to vector<9x9xf32>
    %39 = arith.mulf %37, %38 : vector<9x9xf32>
    %cst_17 = arith.constant dense<0xFF800000> : vector<9xf32>
    %40 = vector.multi_reduction <maximumf>, %39, %cst_17 [1] : vector<9x9xf32> to vector<9xf32>
    %41 = vector.shape_cast %40 : vector<9xf32> to vector<9x1xf32>
    %42 = vector.broadcast %41 : vector<9x1xf32> to vector<9x9xf32>
    %43 = arith.subf %39, %42 : vector<9x9xf32>
    %44 = math.exp %43 : vector<9x9xf32>
    %cst_18 = arith.constant dense<0.000000e+00> : vector<9xf32>
    %45 = vector.multi_reduction <add>, %44, %cst_18 [1] : vector<9x9xf32> to vector<9xf32>
    %46 = vector.shape_cast %45 : vector<9xf32> to vector<9x1xf32>
    %47 = tpu.reciprocal %46 {approx = true} : vector<9x1xf32> -> vector<9x1xf32>
    %48 = vector.broadcast %47 : vector<9x1xf32> to vector<9x9xf32>
    %49 = arith.mulf %44, %48 : vector<9x9xf32>
    %50 = arith.truncf %49 : vector<9x9xf32> to vector<9x9xbf16>
    %51 = arith.truncf %34 : vector<9x8xf32> to vector<9x8xbf16>
    %cst_19 = arith.constant dense<0.000000e+00> : vector<9x8xf32>
    %52 = tpu.matmul %50, %51, %cst_19 {dimension_numbers = #tpu.dot_dimension_numbers<[1], [0], [0], [1], [0, 0, 1, 1], [], []>} : vector<9x9xbf16>, vector<9x8xbf16>, vector<9x8xf32> -> vector<9x8xf32>
    %53 = vector.extract_strided_slice %31 {offsets = [0, 8], sizes = [9, 8], strides = [1, 1]} : vector<9x96xf32> to vector<9x8xf32>
    %54 = vector.extract_strided_slice %31 {offsets = [0, 40], sizes = [9, 8], strides = [1, 1]} : vector<9x96xf32> to vector<9x8xf32>
    %55 = vector.extract_strided_slice %31 {offsets = [0, 72], sizes = [9, 8], strides = [1, 1]} : vector<9x96xf32> to vector<9x8xf32>
    %56 = arith.truncf %53 : vector<9x8xf32> to vector<9x8xbf16>
    %57 = arith.truncf %54 : vector<9x8xf32> to vector<9x8xbf16>
    %cst_20 = arith.constant dense<0.000000e+00> : vector<9x9xf32>
    %58 = tpu.matmul %56, %57, %cst_20 {dimension_numbers = #tpu.dot_dimension_numbers<[1], [1], [0], [0], [0, 0, 1, 0], [], []>} : vector<9x8xbf16>, vector<9x8xbf16>, vector<9x9xf32> -> vector<9x9xf32>
    %cst_21 = arith.constant 0.353553385 : f32
    %59 = vector.broadcast %cst_21 : f32 to vector<9x9xf32>
    %60 = arith.mulf %58, %59 : vector<9x9xf32>
    %cst_22 = arith.constant dense<0xFF800000> : vector<9xf32>
    %61 = vector.multi_reduction <maximumf>, %60, %cst_22 [1] : vector<9x9xf32> to vector<9xf32>
    %62 = vector.shape_cast %61 : vector<9xf32> to vector<9x1xf32>
    %63 = vector.broadcast %62 : vector<9x1xf32> to vector<9x9xf32>
    %64 = arith.subf %60, %63 : vector<9x9xf32>
    %65 = math.exp %64 : vector<9x9xf32>
    %cst_23 = arith.constant dense<0.000000e+00> : vector<9xf32>
    %66 = vector.multi_reduction <add>, %65, %cst_23 [1] : vector<9x9xf32> to vector<9xf32>
    %67 = vector.shape_cast %66 : vector<9xf32> to vector<9x1xf32>
    %68 = tpu.reciprocal %67 {approx = true} : vector<9x1xf32> -> vector<9x1xf32>
    %69 = vector.broadcast %68 : vector<9x1xf32> to vector<9x9xf32>
    %70 = arith.mulf %65, %69 : vector<9x9xf32>
    %71 = arith.truncf %70 : vector<9x9xf32> to vector<9x9xbf16>
    %72 = arith.truncf %55 : vector<9x8xf32> to vector<9x8xbf16>
    %cst_24 = arith.constant dense<0.000000e+00> : vector<9x8xf32>
    %73 = tpu.matmul %71, %72, %cst_24 {dimension_numbers = #tpu.dot_dimension_numbers<[1], [0], [0], [1], [0, 0, 1, 1], [], []>} : vector<9x9xbf16>, vector<9x8xbf16>, vector<9x8xf32> -> vector<9x8xf32>
    %74 = vector.extract_strided_slice %31 {offsets = [0, 16], sizes = [9, 8], strides = [1, 1]} : vector<9x96xf32> to vector<9x8xf32>
    %75 = vector.extract_strided_slice %31 {offsets = [0, 48], sizes = [9, 8], strides = [1, 1]} : vector<9x96xf32> to vector<9x8xf32>
    %76 = vector.extract_strided_slice %31 {offsets = [0, 80], sizes = [9, 8], strides = [1, 1]} : vector<9x96xf32> to vector<9x8xf32>
    %77 = arith.truncf %74 : vector<9x8xf32> to vector<9x8xbf16>
    %78 = arith.truncf %75 : vector<9x8xf32> to vector<9x8xbf16>
    %cst_25 = arith.constant dense<0.000000e+00> : vector<9x9xf32>
    %79 = tpu.matmul %77, %78, %cst_25 {dimension_numbers = #tpu.dot_dimension_numbers<[1], [1], [0], [0], [0, 0, 1, 0], [], []>} : vector<9x8xbf16>, vector<9x8xbf16>, vector<9x9xf32> -> vector<9x9xf32>
    %cst_26 = arith.constant 0.353553385 : f32
    %80 = vector.broadcast %cst_26 : f32 to vector<9x9xf32>
    %81 = arith.mulf %79, %80 : vector<9x9xf32>
    %cst_27 = arith.constant dense<0xFF800000> : vector<9xf32>
    %82 = vector.multi_reduction <maximumf>, %81, %cst_27 [1] : vector<9x9xf32> to vector<9xf32>
    %83 = vector.shape_cast %82 : vector<9xf32> to vector<9x1xf32>
    %84 = vector.broadcast %83 : vector<9x1xf32> to vector<9x9xf32>
    %85 = arith.subf %81, %84 : vector<9x9xf32>
    %86 = math.exp %85 : vector<9x9xf32>
    %cst_28 = arith.constant dense<0.000000e+00> : vector<9xf32>
    %87 = vector.multi_reduction <add>, %86, %cst_28 [1] : vector<9x9xf32> to vector<9xf32>
    %88 = vector.shape_cast %87 : vector<9xf32> to vector<9x1xf32>
    %89 = tpu.reciprocal %88 {approx = true} : vector<9x1xf32> -> vector<9x1xf32>
    %90 = vector.broadcast %89 : vector<9x1xf32> to vector<9x9xf32>
    %91 = arith.mulf %86, %90 : vector<9x9xf32>
    %92 = arith.truncf %91 : vector<9x9xf32> to vector<9x9xbf16>
    %93 = arith.truncf %76 : vector<9x8xf32> to vector<9x8xbf16>
    %cst_29 = arith.constant dense<0.000000e+00> : vector<9x8xf32>
    %94 = tpu.matmul %92, %93, %cst_29 {dimension_numbers = #tpu.dot_dimension_numbers<[1], [0], [0], [1], [0, 0, 1, 1], [], []>} : vector<9x9xbf16>, vector<9x8xbf16>, vector<9x8xf32> -> vector<9x8xf32>
    %95 = vector.extract_strided_slice %31 {offsets = [0, 24], sizes = [9, 8], strides = [1, 1]} : vector<9x96xf32> to vector<9x8xf32>
    %96 = vector.extract_strided_slice %31 {offsets = [0, 56], sizes = [9, 8], strides = [1, 1]} : vector<9x96xf32> to vector<9x8xf32>
    %97 = vector.extract_strided_slice %31 {offsets = [0, 88], sizes = [9, 8], strides = [1, 1]} : vector<9x96xf32> to vector<9x8xf32>
    %98 = arith.truncf %95 : vector<9x8xf32> to vector<9x8xbf16>
    %99 = arith.truncf %96 : vector<9x8xf32> to vector<9x8xbf16>
    %cst_30 = arith.constant dense<0.000000e+00> : vector<9x9xf32>
    %100 = tpu.matmul %98, %99, %cst_30 {dimension_numbers = #tpu.dot_dimension_numbers<[1], [1], [0], [0], [0, 0, 1, 0], [], []>} : vector<9x8xbf16>, vector<9x8xbf16>, vector<9x9xf32> -> vector<9x9xf32>
    %cst_31 = arith.constant 0.353553385 : f32
    %101 = vector.broadcast %cst_31 : f32 to vector<9x9xf32>
    %102 = arith.mulf %100, %101 : vector<9x9xf32>
    %cst_32 = arith.constant dense<0xFF800000> : vector<9xf32>
    %103 = vector.multi_reduction <maximumf>, %102, %cst_32 [1] : vector<9x9xf32> to vector<9xf32>
    %104 = vector.shape_cast %103 : vector<9xf32> to vector<9x1xf32>
    %105 = vector.broadcast %104 : vector<9x1xf32> to vector<9x9xf32>
    %106 = arith.subf %102, %105 : vector<9x9xf32>
    %107 = math.exp %106 : vector<9x9xf32>
    %cst_33 = arith.constant dense<0.000000e+00> : vector<9xf32>
    %108 = vector.multi_reduction <add>, %107, %cst_33 [1] : vector<9x9xf32> to vector<9xf32>
    %109 = vector.shape_cast %108 : vector<9xf32> to vector<9x1xf32>
    %110 = tpu.reciprocal %109 {approx = true} : vector<9x1xf32> -> vector<9x1xf32>
    %111 = vector.broadcast %110 : vector<9x1xf32> to vector<9x9xf32>
    %112 = arith.mulf %107, %111 : vector<9x9xf32>
    %113 = arith.truncf %112 : vector<9x9xf32> to vector<9x9xbf16>
    %114 = arith.truncf %97 : vector<9x8xf32> to vector<9x8xbf16>
    %cst_34 = arith.constant dense<0.000000e+00> : vector<9x8xf32>
    %115 = tpu.matmul %113, %114, %cst_34 {dimension_numbers = #tpu.dot_dimension_numbers<[1], [0], [0], [1], [0, 0, 1, 1], [], []>} : vector<9x9xbf16>, vector<9x8xbf16>, vector<9x8xf32> -> vector<9x8xf32>
    %116 = tpu.concatenate %52, %73, %94, %115 in 1 : vector<9x8xf32>, vector<9x8xf32>, vector<9x8xf32>, vector<9x8xf32> -> vector<9x32xf32>
    %117 = arith.truncf %116 : vector<9x32xf32> to vector<9x32xbf16>
    %c0_35 = arith.constant 0 : index
    %c0_36 = arith.constant 0 : index
    %118 = vector.load %arg6[%c0_35, %c0_36] : memref<32x32xbf16, #tpu.memory_space<vmem>>, vector<32x32xbf16>
    %cst_37 = arith.constant dense<0.000000e+00> : vector<9x32xf32>
    %119 = tpu.matmul %117, %118, %cst_37 {dimension_numbers = #tpu.dot_dimension_numbers<[1], [0], [0], [1], [0, 0, 1, 1], [], []>} : vector<9x32xbf16>, vector<32x32xbf16>, vector<9x32xf32> -> vector<9x32xf32>
    %120 = arith.addf %1, %119 : vector<9x32xf32>
    %c0_38 = arith.constant 0 : index
    %c0_39 = arith.constant 0 : index
    %121 = vector.load %arg7[%c0_38, %c0_39] : memref<1x32xf32, #tpu.memory_space<vmem>>, vector<1x32xf32>
    %122 = vector.broadcast %121 : vector<1x32xf32> to vector<9x32xf32>
    %123 = arith.addf %120, %122 : vector<9x32xf32>
    %c0_40 = arith.constant 0 : index
    %c0_41 = arith.constant 0 : index
    %124 = vector.load %arg8[%c0_40, %c0_41] : memref<1x32xf32, #tpu.memory_space<vmem>>, vector<1x32xf32>
    %c0_42 = arith.constant 0 : index
    %c0_43 = arith.constant 0 : index
    %125 = vector.load %arg9[%c0_42, %c0_43] : memref<1x32xf32, #tpu.memory_space<vmem>>, vector<1x32xf32>
    %cst_44 = arith.constant dense<0.000000e+00> : vector<9xf32>
    %126 = vector.multi_reduction <add>, %123, %cst_44 [1] : vector<9x32xf32> to vector<9xf32>
    %127 = vector.shape_cast %126 : vector<9xf32> to vector<9x1xf32>
    %cst_45 = arith.constant 3.200000e+01 : f32
    %128 = vector.broadcast %cst_45 : f32 to vector<9x1xf32>
    %129 = arith.divf %127, %128 : vector<9x1xf32>
    %130 = vector.broadcast %129 : vector<9x1xf32> to vector<9x32xf32>
    %131 = arith.subf %123, %130 : vector<9x32xf32>
    %132 = arith.mulf %131, %131 : vector<9x32xf32>
    %cst_46 = arith.constant dense<0.000000e+00> : vector<9xf32>
    %133 = vector.multi_reduction <add>, %132, %cst_46 [1] : vector<9x32xf32> to vector<9xf32>
    %134 = vector.shape_cast %133 : vector<9xf32> to vector<9x1xf32>
    %cst_47 = arith.constant 3.200000e+01 : f32
    %135 = vector.broadcast %cst_47 : f32 to vector<9x1xf32>
    %136 = arith.divf %134, %135 : vector<9x1xf32>
    %137 = vector.broadcast %129 : vector<9x1xf32> to vector<9x32xf32>
    %138 = arith.subf %123, %137 : vector<9x32xf32>
    %cst_48 = arith.constant 9.99999974E-6 : f32
    %139 = vector.broadcast %cst_48 : f32 to vector<9x1xf32>
    %140 = arith.addf %136, %139 : vector<9x1xf32>
    %141 = math.rsqrt %140 : vector<9x1xf32>
    %142 = vector.broadcast %141 : vector<9x1xf32> to vector<9x32xf32>
    %143 = arith.mulf %138, %142 : vector<9x32xf32>
    %144 = vector.broadcast %124 : vector<1x32xf32> to vector<9x32xf32>
    %145 = arith.mulf %143, %144 : vector<9x32xf32>
    %146 = vector.broadcast %125 : vector<1x32xf32> to vector<9x32xf32>
    %147 = arith.addf %145, %146 : vector<9x32xf32>
    %148 = arith.truncf %147 : vector<9x32xf32> to vector<9x32xbf16>
    %c0_49 = arith.constant 0 : index
    %c0_50 = arith.constant 0 : index
    %149 = vector.load %arg10[%c0_49, %c0_50] : memref<32x64xbf16, #tpu.memory_space<vmem>>, vector<32x64xbf16>
    %cst_51 = arith.constant dense<0.000000e+00> : vector<9x64xf32>
    %150 = tpu.matmul %148, %149, %cst_51 {dimension_numbers = #tpu.dot_dimension_numbers<[1], [0], [0], [1], [0, 0, 1, 1], [], []>} : vector<9x32xbf16>, vector<32x64xbf16>, vector<9x64xf32> -> vector<9x64xf32>
    %c0_52 = arith.constant 0 : index
    %c0_53 = arith.constant 0 : index
    %151 = vector.load %arg11[%c0_52, %c0_53] : memref<1x64xf32, #tpu.memory_space<vmem>>, vector<1x64xf32>
    %152 = vector.broadcast %151 : vector<1x64xf32> to vector<9x64xf32>
    %153 = arith.addf %150, %152 : vector<9x64xf32>
    %cst_54 = arith.constant 5.000000e-01 : f32
    %154 = vector.broadcast %cst_54 : f32 to vector<9x64xf32>
    %155 = arith.mulf %154, %153 : vector<9x64xf32>
    %cst_55 = arith.constant 4.471500e-02 : f32
    %156 = vector.broadcast %cst_55 : f32 to vector<9x64xf32>
    %157 = arith.mulf %156, %153 : vector<9x64xf32>
    %158 = arith.mulf %157, %153 : vector<9x64xf32>
    %159 = arith.mulf %158, %153 : vector<9x64xf32>
    %160 = arith.addf %153, %159 : vector<9x64xf32>
    %cst_56 = arith.constant 0.797884583 : f32
    %161 = vector.broadcast %cst_56 : f32 to vector<9x64xf32>
    %162 = arith.mulf %161, %160 : vector<9x64xf32>
    %163 = math.tanh %162 : vector<9x64xf32>
    %cst_57 = arith.constant 1.000000e+00 : f32
    %164 = vector.broadcast %cst_57 : f32 to vector<9x64xf32>
    %165 = arith.addf %164, %163 : vector<9x64xf32>
    %166 = arith.mulf %155, %165 : vector<9x64xf32>
    %167 = arith.truncf %166 : vector<9x64xf32> to vector<9x64xbf16>
    %c0_58 = arith.constant 0 : index
    %c0_59 = arith.constant 0 : index
    %168 = vector.load %arg12[%c0_58, %c0_59] : memref<64x32xbf16, #tpu.memory_space<vmem>>, vector<64x32xbf16>
    %cst_60 = arith.constant dense<0.000000e+00> : vector<9x32xf32>
    %169 = tpu.matmul %167, %168, %cst_60 {dimension_numbers = #tpu.dot_dimension_numbers<[1], [0], [0], [1], [0, 0, 1, 1], [], []>} : vector<9x64xbf16>, vector<64x32xbf16>, vector<9x32xf32> -> vector<9x32xf32>
    %170 = arith.addf %123, %169 : vector<9x32xf32>
    %c0_61 = arith.constant 0 : index
    %c0_62 = arith.constant 0 : index
    %171 = vector.load %arg13[%c0_61, %c0_62] : memref<1x32xf32, #tpu.memory_space<vmem>>, vector<1x32xf32>
    %172 = vector.broadcast %171 : vector<1x32xf32> to vector<9x32xf32>
    %173 = arith.addf %170, %172 : vector<9x32xf32>
    %174 = vector.shape_cast %173 : vector<9x32xf32> to vector<1x9x32xf32>
    %c0_63 = arith.constant 0 : index
    %c0_64 = arith.constant 0 : index
    %c0_65 = arith.constant 0 : index
    %175 = vector.load %arg14[%c0_63, %c0_64, %c0_65] : memref<1x9x32xf32, #tpu.memory_space<vmem>>, vector<1x9x32xf32>
    tpu.vector_store %arg14[%c0_63, %c0_64, %c0_65], %174 {strides = array<i32>} : memref<1x9x32xf32, #tpu.memory_space<vmem>>, vector<1x9x32xf32>,
    return
  }
  func.func @transform_0(%arg0: i32) -> (i32, i32, i32) {
    %c0_i32 = arith.constant 0 : i32
    %c0_i32_0 = arith.constant 0 : i32
    %c0_i32_1 = arith.constant 0 : i32
    return %arg0, %c0_i32, %c0_i32_0 : i32, i32, i32
  }
  func.func @transform_1(%arg0: i32) -> (i32, i32) {
    %c0_i32 = arith.constant 0 : i32
    %c0_i32_0 = arith.constant 0 : i32
    %c0_i32_1 = arith.constant 0 : i32
    return %c0_i32, %c0_i32_0 : i32, i32
  }
  func.func @transform_2(%arg0: i32) -> (i32, i32) {
    %c0_i32 = arith.constant 0 : i32
    %c0_i32_0 = arith.constant 0 : i32
    %c0_i32_1 = arith.constant 0 : i32
    return %c0_i32, %c0_i32_0 : i32, i32
  }
  func.func @transform_3(%arg0: i32) -> (i32, i32) {
    %c0_i32 = arith.constant 0 : i32
    %c0_i32_0 = arith.constant 0 : i32
    %c0_i32_1 = arith.constant 0 : i32
    return %c0_i32, %c0_i32_0 : i32, i32
  }
  func.func @transform_4(%arg0: i32) -> (i32, i32) {
    %c0_i32 = arith.constant 0 : i32
    %c0_i32_0 = arith.constant 0 : i32
    %c0_i32_1 = arith.constant 0 : i32
    return %c0_i32, %c0_i32_0 : i32, i32
  }
  func.func @transform_5(%arg0: i32) -> (i32, i32) {
    %c0_i32 = arith.constant 0 : i32
    %c0_i32_0 = arith.constant 0 : i32
    %c0_i32_1 = arith.constant 0 : i32
    return %c0_i32, %c0_i32_0 : i32, i32
  }
  func.func @transform_6(%arg0: i32) -> (i32, i32) {
    %c0_i32 = arith.constant 0 : i32
    %c0_i32_0 = arith.constant 0 : i32
    %c0_i32_1 = arith.constant 0 : i32
    return %c0_i32, %c0_i32_0 : i32, i32
  }
  func.func @transform_7(%arg0: i32) -> (i32, i32) {
    %c0_i32 = arith.constant 0 : i32
    %c0_i32_0 = arith.constant 0 : i32
    %c0_i32_1 = arith.constant 0 : i32
    return %c0_i32, %c0_i32_0 : i32, i32
  }
  func.func @transform_8(%arg0: i32) -> (i32, i32) {
    %c0_i32 = arith.constant 0 : i32
    %c0_i32_0 = arith.constant 0 : i32
    %c0_i32_1 = arith.constant 0 : i32
    return %c0_i32, %c0_i32_0 : i32, i32
  }
  func.func @transform_9(%arg0: i32) -> (i32, i32) {
    %c0_i32 = arith.constant 0 : i32
    %c0_i32_0 = arith.constant 0 : i32
    %c0_i32_1 = arith.constant 0 : i32
    return %c0_i32, %c0_i32_0 : i32, i32
  }
  func.func @transform_10(%arg0: i32) -> (i32, i32) {
    %c0_i32 = arith.constant 0 : i32
    %c0_i32_0 = arith.constant 0 : i32
    %c0_i32_1 = arith.constant 0 : i32
    return %c0_i32, %c0_i32_0 : i32, i32
  }
  func.func @transform_11(%arg0: i32) -> (i32, i32) {
    %c0_i32 = arith.constant 0 : i32
    %c0_i32_0 = arith.constant 0 : i32
    %c0_i32_1 = arith.constant 0 : i32
    return %c0_i32, %c0_i32_0 : i32, i32
  }
  func.func @transform_12(%arg0: i32) -> (i32, i32) {
    %c0_i32 = arith.constant 0 : i32
    %c0_i32_0 = arith.constant 0 : i32
    %c0_i32_1 = arith.constant 0 : i32
    return %c0_i32, %c0_i32_0 : i32, i32
  }
  func.func @transform_13(%arg0: i32) -> (i32, i32, i32) {
    %c0_i32 = arith.constant 0 : i32
    %c0_i32_0 = arith.constant 0 : i32
    %c0_i32_1 = arith.constant 0 : i32
    return %arg0, %c0_i32, %c0_i32_0 : i32, i32, i32
  }
}

module attributes {stable_mosaic.version = 11 : i64} {
  func.func @head_kernel(%arg0: i32, %arg1: memref<1x9x32xf32, #tpu.memory_space<vmem>>, %arg2: memref<1x32xf32, #tpu.memory_space<vmem>>, %arg3: memref<1x32xf32, #tpu.memory_space<vmem>>, %arg4: memref<1x32xf32, #tpu.memory_space<vmem>>, %arg5: memref<1x1xf32, #tpu.memory_space<vmem>>, %arg6: memref<32x128xbf16, #tpu.memory_space<vmem>>, %arg7: memref<1x128xf32, #tpu.memory_space<vmem>>, %arg8: memref<1x1x128xf32, #tpu.memory_space<vmem>>) attributes {dimension_semantics = [#tpu.dimension_semantics<parallel>], iteration_bounds = array<i64: 2>, scalar_prefetch = 0 : i64, scratch_operands = 0 : i64, tpu.core_type = #tpu.core_type<tc>, window_params = [{transform_indices = @transform_0, window_bounds = array<i64: 1, 9, 32>}, {pipeline_mode = #tpu.pipeline_mode<synchronous>, transform_indices = @transform_1, window_bounds = array<i64: 1, 32>}, {pipeline_mode = #tpu.pipeline_mode<synchronous>, transform_indices = @transform_2, window_bounds = array<i64: 1, 32>}, {pipeline_mode = #tpu.pipeline_mode<synchronous>, transform_indices = @transform_3, window_bounds = array<i64: 1, 32>}, {pipeline_mode = #tpu.pipeline_mode<synchronous>, transform_indices = @transform_4, window_bounds = array<i64: 1, 1>}, {pipeline_mode = #tpu.pipeline_mode<synchronous>, transform_indices = @transform_5, window_bounds = array<i64: 32, 128>}, {pipeline_mode = #tpu.pipeline_mode<synchronous>, transform_indices = @transform_6, window_bounds = array<i64: 1, 128>}, {transform_indices = @transform_7, window_bounds = array<i64: 1, 1, 128>}]} {
    %c0 = arith.constant 0 : index
    %c0_0 = arith.constant 0 : index
    %c0_1 = arith.constant 0 : index
    %0 = vector.load %arg1[%c0, %c0_0, %c0_1] : memref<1x9x32xf32, #tpu.memory_space<vmem>>, vector<1x9x32xf32>
    %1 = vector.shape_cast %0 : vector<1x9x32xf32> to vector<9x32xf32>
    %c0_2 = arith.constant 0 : index
    %c0_3 = arith.constant 0 : index
    %2 = vector.load %arg2[%c0_2, %c0_3] : memref<1x32xf32, #tpu.memory_space<vmem>>, vector<1x32xf32>
    %c0_4 = arith.constant 0 : index
    %c0_5 = arith.constant 0 : index
    %3 = vector.load %arg3[%c0_4, %c0_5] : memref<1x32xf32, #tpu.memory_space<vmem>>, vector<1x32xf32>
    %cst = arith.constant dense<0.000000e+00> : vector<9xf32>
    %4 = vector.multi_reduction <add>, %1, %cst [1] : vector<9x32xf32> to vector<9xf32>
    %5 = vector.shape_cast %4 : vector<9xf32> to vector<9x1xf32>
    %cst_6 = arith.constant 3.200000e+01 : f32
    %6 = vector.broadcast %cst_6 : f32 to vector<9x1xf32>
    %7 = arith.divf %5, %6 : vector<9x1xf32>
    %8 = vector.broadcast %7 : vector<9x1xf32> to vector<9x32xf32>
    %9 = arith.subf %1, %8 : vector<9x32xf32>
    %10 = arith.mulf %9, %9 : vector<9x32xf32>
    %cst_7 = arith.constant dense<0.000000e+00> : vector<9xf32>
    %11 = vector.multi_reduction <add>, %10, %cst_7 [1] : vector<9x32xf32> to vector<9xf32>
    %12 = vector.shape_cast %11 : vector<9xf32> to vector<9x1xf32>
    %cst_8 = arith.constant 3.200000e+01 : f32
    %13 = vector.broadcast %cst_8 : f32 to vector<9x1xf32>
    %14 = arith.divf %12, %13 : vector<9x1xf32>
    %15 = vector.broadcast %7 : vector<9x1xf32> to vector<9x32xf32>
    %16 = arith.subf %1, %15 : vector<9x32xf32>
    %cst_9 = arith.constant 9.99999974E-6 : f32
    %17 = vector.broadcast %cst_9 : f32 to vector<9x1xf32>
    %18 = arith.addf %14, %17 : vector<9x1xf32>
    %19 = math.rsqrt %18 : vector<9x1xf32>
    %20 = vector.broadcast %19 : vector<9x1xf32> to vector<9x32xf32>
    %21 = arith.mulf %16, %20 : vector<9x32xf32>
    %22 = vector.broadcast %2 : vector<1x32xf32> to vector<9x32xf32>
    %23 = arith.mulf %21, %22 : vector<9x32xf32>
    %24 = vector.broadcast %3 : vector<1x32xf32> to vector<9x32xf32>
    %25 = arith.addf %23, %24 : vector<9x32xf32>
    %c0_10 = arith.constant 0 : index
    %c0_11 = arith.constant 0 : index
    %26 = vector.load %arg4[%c0_10, %c0_11] : memref<1x32xf32, #tpu.memory_space<vmem>>, vector<1x32xf32>
    %27 = vector.broadcast %26 : vector<1x32xf32> to vector<9x32xf32>
    %28 = arith.mulf %25, %27 : vector<9x32xf32>
    %cst_12 = arith.constant dense<0.000000e+00> : vector<9xf32>
    %29 = vector.multi_reduction <add>, %28, %cst_12 [1] : vector<9x32xf32> to vector<9xf32>
    %30 = vector.shape_cast %29 : vector<9xf32> to vector<9x1xf32>
    %c0_13 = arith.constant 0 : index
    %c0_14 = arith.constant 0 : index
    %31 = vector.load %arg5[%c0_13, %c0_14] : memref<1x1xf32, #tpu.memory_space<vmem>>, vector<1x1xf32>
    %32 = vector.broadcast %31 : vector<1x1xf32> to vector<9x1xf32>
    %33 = arith.addf %30, %32 : vector<9x1xf32>
    %cst_15 = arith.constant dense<0xFF800000> : vector<1xf32>
    %34 = vector.multi_reduction <maximumf>, %33, %cst_15 [0] : vector<9x1xf32> to vector<1xf32>
    %35 = vector.shape_cast %34 : vector<1xf32> to vector<1x1xf32>
    %36 = vector.broadcast %35 : vector<1x1xf32> to vector<9x1xf32>
    %37 = arith.subf %33, %36 : vector<9x1xf32>
    %38 = math.exp %37 : vector<9x1xf32>
    %cst_16 = arith.constant dense<0.000000e+00> : vector<1xf32>
    %39 = vector.multi_reduction <add>, %38, %cst_16 [0] : vector<9x1xf32> to vector<1xf32>
    %40 = vector.shape_cast %39 : vector<1xf32> to vector<1x1xf32>
    %41 = tpu.reciprocal %40 {approx = true} : vector<1x1xf32> -> vector<1x1xf32>
    %42 = vector.broadcast %41 : vector<1x1xf32> to vector<9x1xf32>
    %43 = arith.mulf %38, %42 : vector<9x1xf32>
    %44 = vector.broadcast %43 : vector<9x1xf32> to vector<9x32xf32>
    %45 = arith.mulf %44, %25 : vector<9x32xf32>
    %cst_17 = arith.constant dense<0.000000e+00> : vector<32xf32>
    %46 = vector.multi_reduction <add>, %45, %cst_17 [0] : vector<9x32xf32> to vector<32xf32>
    %47 = vector.shape_cast %46 : vector<32xf32> to vector<1x32xf32>
    %48 = arith.truncf %47 : vector<1x32xf32> to vector<1x32xbf16>
    %c0_18 = arith.constant 0 : index
    %c0_19 = arith.constant 0 : index
    %49 = vector.load %arg6[%c0_18, %c0_19] : memref<32x128xbf16, #tpu.memory_space<vmem>>, vector<32x128xbf16>
    %cst_20 = arith.constant dense<0.000000e+00> : vector<1x128xf32>
    %50 = tpu.matmul %48, %49, %cst_20 {dimension_numbers = #tpu.dot_dimension_numbers<[1], [0], [0], [1], [0, 0, 1, 1], [], []>} : vector<1x32xbf16>, vector<32x128xbf16>, vector<1x128xf32> -> vector<1x128xf32>
    %c0_21 = arith.constant 0 : index
    %c0_22 = arith.constant 0 : index
    %51 = vector.load %arg7[%c0_21, %c0_22] : memref<1x128xf32, #tpu.memory_space<vmem>>, vector<1x128xf32>
    %52 = arith.addf %50, %51 : vector<1x128xf32>
    %53 = vector.shape_cast %52 : vector<1x128xf32> to vector<1x1x128xf32>
    %c0_23 = arith.constant 0 : index
    %c0_24 = arith.constant 0 : index
    %c0_25 = arith.constant 0 : index
    %54 = vector.load %arg8[%c0_23, %c0_24, %c0_25] : memref<1x1x128xf32, #tpu.memory_space<vmem>>, vector<1x1x128xf32>
    tpu.vector_store %arg8[%c0_23, %c0_24, %c0_25], %53 {strides = array<i32>} : memref<1x1x128xf32, #tpu.memory_space<vmem>>, vector<1x1x128xf32>,
    return
  }
  func.func @transform_0(%arg0: i32) -> (i32, i32, i32) {
    %c0_i32 = arith.constant 0 : i32
    %c0_i32_0 = arith.constant 0 : i32
    %c0_i32_1 = arith.constant 0 : i32
    return %arg0, %c0_i32, %c0_i32_0 : i32, i32, i32
  }
  func.func @transform_1(%arg0: i32) -> (i32, i32) {
    %c0_i32 = arith.constant 0 : i32
    %c0_i32_0 = arith.constant 0 : i32
    %c0_i32_1 = arith.constant 0 : i32
    return %c0_i32, %c0_i32_0 : i32, i32
  }
  func.func @transform_2(%arg0: i32) -> (i32, i32) {
    %c0_i32 = arith.constant 0 : i32
    %c0_i32_0 = arith.constant 0 : i32
    %c0_i32_1 = arith.constant 0 : i32
    return %c0_i32, %c0_i32_0 : i32, i32
  }
  func.func @transform_3(%arg0: i32) -> (i32, i32) {
    %c0_i32 = arith.constant 0 : i32
    %c0_i32_0 = arith.constant 0 : i32
    %c0_i32_1 = arith.constant 0 : i32
    return %c0_i32, %c0_i32_0 : i32, i32
  }
  func.func @transform_4(%arg0: i32) -> (i32, i32) {
    %c0_i32 = arith.constant 0 : i32
    %c0_i32_0 = arith.constant 0 : i32
    %c0_i32_1 = arith.constant 0 : i32
    return %c0_i32, %c0_i32_0 : i32, i32
  }
  func.func @transform_5(%arg0: i32) -> (i32, i32) {
    %c0_i32 = arith.constant 0 : i32
    %c0_i32_0 = arith.constant 0 : i32
    %c0_i32_1 = arith.constant 0 : i32
    return %c0_i32, %c0_i32_0 : i32, i32
  }
  func.func @transform_6(%arg0: i32) -> (i32, i32) {
    %c0_i32 = arith.constant 0 : i32
    %c0_i32_0 = arith.constant 0 : i32
    %c0_i32_1 = arith.constant 0 : i32
    return %c0_i32, %c0_i32_0 : i32, i32
  }
  func.func @transform_7(%arg0: i32) -> (i32, i32, i32) {
    %c0_i32 = arith.constant 0 : i32
    %c0_i32_0 = arith.constant 0 : i32
    %c0_i32_1 = arith.constant 0 : i32
    return %arg0, %c0_i32, %c0_i32_0 : i32, i32, i32
  }
}

</mosaic_0001>

<bundles_post_ra>
// kernel: memory_cvt_forward.4
= control target key start
LH: loop header
LB: loop body
LE: loop exit
PB: predicated region body
PF: predicated region fallthrough
CT: control target
= control target key end

     0   :  { %v170_v0 = vmov 0.0   ;;  %vm171_vm0 = vmmov 0   ;;  %vm77_vm1 = vcmask 785408   ;;  %vm122_vm2 = vcmask 261120   ;;  %s222_s1 = inlined_call_operand.vmem [shape: bf16[96,32], index: 1, kind: input, shape index: {}]   ;;  %s223_s0 = inlined_call_operand.vmem [shape: bf16[16,96], index: 0, kind: input, shape index: {}]   ;;  %s224_s2 = inlined_call_operand.vmem [shape: f32[1,32], index: 2, kind: input, shape index: {}]   ;;  %s225_s3 = inlined_call_operand.vmem [shape: f32[16,32], index: 3, kind: output, shape index: {}]  }
   0x1   :  { %145 = vmatprep.subr.bf16.mxu0 %v170_v0  ;;  %v163_v1 = vld [vmem:[%s222_s1] sm:$0xff]   ;;  %157 = vmatprep.mubr.msk.bf16.mxu0 %vm171_vm0, %v170_v0  ;;  %v164_v2 = vld [vmem:[%s222_s1 + $0x8] sm:$0xff]   ;;  %v165_v3 = vld [vmem:[%s222_s1 + $0x10] sm:$0xff]  }
   0x2   :  { %146 = vmatpush3.bf16.msra.mxu0 %v163_v1  ;;  %v166_v4 = vld [vmem:[%s222_s1 + $0x18] sm:$0xff]   ;;  %v167_v5 = vld [vmem:[%s222_s1 + $0x20] sm:$0xff]   ;;  %v168_v6 = vld [vmem:[%s222_s1 + $0x28] sm:$0xff]  }
   0x3   :  { %147 = vmatprep.subr.bf16.mxu0 %v170_v0  ;;  %v169_v7 = vld [vmem:[%s223_s0] sm:$0xff]  }
   0x4   :  { %v129_v8 = vld [vmem:[%s224_s2] ss:$0 sm:$0xff] }
   0x6   :  { %148 = vmatpush3.bf16.msra.mxu0 %v164_v2 }
   0x7   :  { %149 = vmatprep.subr.bf16.mxu0 %v170_v0 }
   0xa   :  { %150 = vmatpush3.bf16.msra.mxu0 %v165_v3 }
   0xb   :  { %151 = vmatprep.subr.bf16.mxu0 %v170_v0 }
   0xe   :  { %152 = vmatpush3.bf16.msra.mxu0 %v166_v4 }
   0xf   :  { %153 = vmatprep.subr.bf16.mxu0 %v170_v0 }
  0x12   :  { %154 = vmatpush3.bf16.msra.mxu0 %v167_v5 }
  0x13   :  { %155 = vmatprep.subr.bf16.mxu0 %v170_v0 }
  0x16   :  { %156 = vmatpush3.bf16.msra.mxu0 %v168_v6 }
  0x19   :  { %158 = vmatmul.mubr.msk.bf16.vlgmr.msra.gmra.mrb[0].mxu0 %vm77_vm1, %v169_v7 }
  0xec   :  { %v115_v9 = vpop.f32.mrb[0].mxu0 }
  0xed   :  { %v116_v10 = vadd.f32 %v129_v8, %v115_v9  ;;  %v159_v11 = vpop.f32.mrb[1].mxu0 }
  0xee   :  { %v118_v12 = vpop.f32.mrb[2].mxu0 }
  0xef   :  { %123 = vst.msk [vmem:[%s225_s3] sm:$0xff] %vm122_vm2, %v116_v10  ;;  %v119_v13 = vadd.f32 %v129_v8, %v118_v12  ;;  %v160_v14 = vpop.f32.mrb[3].mxu0 }
  0xf1   :  { %124 = vst.msk [vmem:[%s225_s3 + $0x8] sm:$0xff] %vm122_vm2, %v119_v13 }

// kernel: memory_cvt_forward.7
= control target key start
LH: loop header
LB: loop body
LE: loop exit
PB: predicated region body
PF: predicated region fallthrough
CT: control target
= control target key end

     0   :  { %s862_s0 = inlined_call_operand.vmem [shape: f32[2,9,32], index: 0, kind: input, shape index: {}]   ;;  %s863_s1 = inlined_call_operand.vmem [shape: f32[1,32], index: 1, kind: input, shape index: {}]   ;;  %s864_s2 = inlined_call_operand.vmem [shape: f32[1,32], index: 2, kind: input, shape index: {}]   ;;  %s865_s3 = inlined_call_operand.vmem [shape: f32[1,32], index: 3, kind: input, shape index: {}]   ;;  %s866_s4 = inlined_call_operand.<no memory space> [shape: f32[1,1], index: 4, kind: input, shape index: {}]   ;;  %s867_s5 = inlined_call_operand.vmem [shape: bf16[32,128], index: 5, kind: input, shape index: {}]   ;;  %s868_s6 = inlined_call_operand.vmem [shape: f32[1,128], index: 6, kind: input, shape index: {}]   ;;  %s869_s7 = inlined_call_operand.hbm [shape: f32[2,1,128], index: 7, kind: output, shape index: {}]  }
   0x1   :  { %v12_v0 = vstv %s866_s4 }
   0x2   :  { %13 = vst [vmem:[#allocation2] sm:$0x1] %v12_v0 }
   0x3   :  { %14 = vsyncpa [#allocation4], 0 }
   0x4   :  { %16 = vsyncpa [#allocation4 + $0x1], 0  ;;  %s727_s26 = smov 0   ;;  %s729_s27 = smov 0  }
   0x5   :  { %s731_s28 = smov 0   ;;  %s733_s29 = smov 0  }
   0x6 LB: > { %s748_s4 = sadd.s32 4294967295, %s678_s29   ;;  %s532_s30 = sadd.s32 4294967294, %s678_s29   ;;  %s678_s29 = sphi %s733_s29, %s875_s29   ;;  %s674_s28 = sphi %s731_s28, %s874_s28   ;;  %s670_s27 = sphi %s729_s27, %s873_s27   ;;  %s666_s26 = sphi %s727_s26, %s872_s26  }
   0x7   : > { %s752_s8 = sadd.s32 1, %s678_s29   ;;  %s181_s9 = sadd.s32 1, %s674_s28 }
   0x8   : > { %s178_s10 = ssub.s32 %s678_s29, %s752_s8  ;;  %p191_p0 = scmp.ne.s32.totalorder %s674_s28, %s670_s27 }
   0x9   : > { %p179_p1 = scmp.eq.s32.totalorder %s178_s10, 0  ;;  %p192_p2 = scmp.eq.s32.totalorder %s748_s4, 1 }
   0xa   : > { %p197_p3 = scmp.ne.s32.totalorder %s670_s27, %s666_s26  ;;  %p198_p4 = scmp.eq.s32.totalorder %s532_s30, 1 }
   0xb   : > { %s763_s11 = scalar_select %p179_p1, %s674_s28, %s181_s9  }
   0xc   : > { %p765_p5 = por %p192_p2, %p191_p0  ;;  %p769_p6 = por %p198_p4, %p197_p3 }
   0xd   : > { %p535_p7 = scmp.ge.s32.totalorder %s678_s29, 1  ;;  %p242_p8 = scmp.lt.s32.totalorder %s678_s29, 3 }
   0xf   : > { %p243_p9 = pnand %p535_p7, %p242_p8 }
  0x10   : > { %p273_p10 = scmp.lt.s32.totalorder (!%p243_p9), %s748_s4, 1  ;;  %vm283_vm0 = vcmask (!%p243_p9), 261120   ;;  %vm287_vm1 = vcmask (!%p243_p9), 253952   ;;  %v538_v22 = vld [vmem:[%s863_s1] ss:$0 sm:$0xff] (!%p243_p9)  ;;  %v680_v36 = vmov (!%p243_p9), 0  }
  0x11   : > { %246 = sbr.rel (%p243_p9) target bundleno = 927 (0x39f), region = 48  ;;  %v539_v24 = vld [vmem:[%s864_s2] ss:$0 sm:$0xff] (!%p243_p9)  ;;  %603 = vset.pattern.permute.xlu1 (!%p243_p9), %v680_v36  ;;  %602 = vset.pattern.permute.xlu0 (!%p243_p9), %v680_v36  ;;  %vm352_vm2 = vcmask (!%p243_p9), 7168   ;;  %vm354_vm3 = vcmask (!%p243_p9), 0   ;;  %vm682_vm4 = vmmov (!%p243_p9), 0  }
  0x12   : > { %v540_v27 = vld [vmem:[%s865_s3] ss:$0 sm:$0xff] (!%p243_p9)  ;;  %s545_s17 = sshll.u32 (!%p243_p9), %s748_s4, 4  ;;  %s683_s24 = smov (!%p243_p9), [#allocation3]  }
  0x13   : > { %v541_v37 = vld [vmem:[#allocation2] ss:$0 sm:$0xff] (!%p243_p9)  ;;  %s820_s22 = scalar_lea.hbm (!%p243_p9), %s869_s7, %s545_s17  ;;  %s620_s25 = sshll.u32 (!%p243_p9), %s683_s24, 4  ;;  %s621_s25 = int_to_ptr.vmem [resolvable:$false] %s620_s25 }
  0x14   : > { %s622_s30 = scalar_lea.vmem (!%p243_p9), %s621_s25, 32 }
  0x18   : > { %s274_s14 = scalar_select %p273_p10, %s748_s4, 1 }
  0x1a   : > { %s548_s15 = sshll.u32 %s274_s14, 4  ;;  %s271_s14 = sand.u32 1, %s670_s27  }
  0x1b   : > { %s277_s18 = scalar_lea.vmem %s862_s0, %s548_s15  ;;  %s465_s23 = scalar_lea.sflag [#allocation4], %s271_s14 }
  0x1c   : > { %v279_v1 = vld [vmem:[%s277_s18] sm:$0xff]  ;;  %v280_v2 = vld [vmem:[%s277_s18 + $0x8] sm:$0x1]  ;;  %s272_s18 = scalar_lea.vmem [#allocation3], %s271_s14 }
  0x1d   : > { %v284_v3 = vsel %vm283_vm0, %v279_v1, 0.0  ;;  %v288_v4 = vsel %vm287_vm1, %v280_v2, 0.0  ;;  %s477_s19 = sshll.u32 %s272_s18, 4  ;;  %s822_s19 = int_to_ptr.vmem [resolvable:$true] %s477_s19 }
  0x1e   : > { %285 = vadd.xlane.f32.xlu0 %v284_v3  ;;  %s616_s4 = scalar_lea.vmem %s822_s19, 16  ;;  %p623_p0 = scmp.lt.s32.totalorder %s822_s19, %s621_s25 }
  0x1f   : > { %p617_p11 = scmp.ne.s32.totalorder %s822_s19, %s616_s4  ;;  %p624_p1 = scmp.lt.s32.totalorder %s622_s30, %s616_s4 }
  0x21   : > { %p618_p12 = pnand %p617_p11, %p765_p5  ;;  %p625_p2 = por %p624_p1, %p623_p0 }
  0x22   : > { %289 = vadd.xlane.f32.xlu0 %v288_v4 }
  0x23   : > { %p619_p13 = pneg %p618_p12 }
  0x25   : > { %p626_p3 = pnand %p625_p2, %p619_p13 }
  0xab   : > { %v286_v5 = vpop.xlane.xlu0 %285 }
  0xac   : > { %v292_v6 = vmul.f32 0.03125, %v286_v5  ;;  %v604_v5 = vld [vmem:[%s867_s5] sm:$0xff]  }
  0xae   : > { %v294_v7 = vsub.f32 %v279_v1, %v292_v6  ;;  %v681_v6 = vmov 0.0  }
  0xaf   : > { %v290_v8 = vpop.xlane.xlu0 %289  ;;  %552 = vmatprep.subr.bf16.mxu0 %v681_v6  ;;  %556 = vmatprep.mubr.msk.bf16.mxu0 %vm682_vm4, %v681_v6 }
  0xb0   : > { %v293_v9 = vmul.f32 0.03125, %v290_v8  ;;  %v296_v10 = vmul.f32 %v294_v7, %v294_v7  ;;  %553 = vmatpush3.bf16.msra.mxu0 %v604_v5 }
  0xb1   : > { %554 = vmatprep.subr.bf16.mxu0 %v681_v6 }
  0xb2   : > { %v295_v11 = vsub.f32 %v280_v2, %v293_v9  ;;  %v298_v12 = vsel %vm283_vm0, %v296_v10, 0.0 }
  0xb3   : > { %299 = vadd.xlane.f32.xlu1 %v298_v12 }
  0xb4   : > { %v297_v13 = vmul.f32 %v295_v11, %v295_v11 }
  0xb6   : > { %v301_v14 = vsel %vm287_vm1, %v297_v13, 0.0 }
  0xb7   : > { %302 = vadd.xlane.f32.xlu1 %v301_v14 }
 0x140   : > { %v300_v15 = vpop.xlane.xlu1 %299 }
 0x141   : > { %v304_v16 = vmul.f32 0.03125, %v300_v15 }
 0x143   : > { %v306_v17 = vadd.f32 1e-05, %v304_v16 }
 0x144   : > { %v303_v18 = vpop.xlane.xlu1 %302 }
 0x145   : > { %606 = vrsqrt.f32 %v306_v17  ;;  %v305_v19 = vmul.f32 0.03125, %v303_v18 }
 0x147   : > { %v307_v20 = vadd.f32 1e-05, %v305_v19 }
 0x149   : > { %608 = vrsqrt.f32 %v307_v20 }
 0x14f   : > { %v607_v21 = vpop.eup %606 }
 0x150   : > { %v310_v23 = vmul.f32 %v607_v21, %v294_v7  ;;  %v605_v7 = vld [vmem:[%s867_s5 + $0x8] sm:$0xff]  }
 0x151   : > { %555 = vmatpush3.bf16.msra.mxu0 %v605_v7 }
 0x152   : > { %v318_v25 = vmul.f32 %v538_v22, %v310_v23 }
 0x153   : > { %v609_v26 = vpop.eup %608 }
 0x154   : > { %v793_v28 = vadd.f32 %v539_v24, %v318_v25  ;;  %v311_v29 = vmul.f32 %v609_v26, %v295_v11 }
 0x156   : > { %v335_v30 = vmul.f32 %v540_v27, %v793_v28  ;;  %v319_v31 = vmul.f32 %v538_v22, %v311_v29  ;;  %v407_v22 = vld [vmem:[%s868_s6] sm:$0x1] }
 0x158   : > { %v337_v32 = vsel %vm283_vm0, %v335_v30, 0.0  ;;  %v327_v33 = vadd.f32 %v539_v24, %v319_v31 }
 0x159   : > { %338 = vadd.xlane.f32.xlu0 %v337_v32 }
 0x15a   : > { %v336_v34 = vmul.f32 %v540_v27, %v327_v33 }
 0x15c   : > { %v340_v35 = vsel %vm287_vm1, %v336_v34, 0.0 }
 0x15d   : > { %341 = vadd.xlane.f32.xlu1 %v340_v35 }
 0x1e6   : > { %v339_v38 = vpop.xlane.xlu0 %338 }
 0x1e7   : > { %v350_v39 = vadd.f32 %v541_v37, %v339_v38 }
 0x1e9   : > { %v353_v42 = vsel %vm352_vm2, %v350_v39, -inf }
 0x1ea   : > { %v342_v40 = vpop.xlane.xlu1 %341 }
 0x1eb   : > { %v351_v41 = vadd.f32 %v541_v37, %v342_v40 }
 0x1ed   : > { %v355_v43 = vsel %vm354_vm3, %v351_v41, -inf }
 0x1ee   : > { %v356_v44 = vmax.f32 %v353_v42, %v355_v43 }
 0x1f0   : > { %v357_v45 = vrot.slane %v356_v44, 4 }
 0x1f2   : > { %v358_v46 = vmax.f32 %v356_v44, %v357_v45 }
 0x1f4   : > { %v359_v47 = vrot.slane %v358_v46, 2 }
 0x1f6   : > { %v360_v48 = vmax.f32 %v358_v46, %v359_v47 }
 0x1f8   : > { %v361_v49 = vrot.slane %v360_v48, 1 }
 0x1fa   : > { %v362_v50 = vmax.f32 %v360_v48, %v361_v49 }
 0x1fc   : > { %v363_v51 = vsub.f32 %v350_v39, %v362_v50  ;;  %v364_v52 = vsub.f32 %v351_v41, %v362_v50 }
 0x1fe   : > { %v365_v53 = vmul.f32 1.442695, %v363_v51  ;;  %v367_v54 = vmul.f32 1.442695, %v364_v52 }
 0x200   : > { %610 = vpow2.f32 %v365_v53 }
 0x201   : > { %612 = vpow2.f32 %v367_v54 }
 0x20a   : > { %v611_v55 = vpop.eup %610 }
 0x20b   : > { %v613_v56 = vpop.eup %612  ;;  %v369_v57 = vsel %vm352_vm2, %v611_v55, 0.0 }
 0x20c   : > { %v370_v58 = vsel %vm354_vm3, %v613_v56, 0.0 }
 0x20d   : > { %v371_v59 = vadd.f32 %v370_v58, %v369_v57 }
 0x20f   : > { %v372_v60 = vrot.slane %v371_v59, 4 }
 0x211   : > { %v373_v61 = vadd.f32 %v372_v60, %v371_v59 }
 0x213   : > { %v374_v62 = vrot.slane %v373_v61, 2 }
 0x215   : > { %v375_v63 = vadd.f32 %v374_v62, %v373_v61 }
 0x217   : > { %v376_v0 = vrot.slane %v375_v63, 1 }
 0x219   : > { %v377_v1 = vadd.f32 %v376_v0, %v375_v63 }
 0x21b   : > { %614 = vrcp.f32 %v377_v1 }
 0x225   : > { %v615_v2 = vpop.eup %614 }
 0x226   : > { %v380_v3 = vmul.f32 %v615_v2, %v613_v56  ;;  %v379_v4 = vmul.f32 %v615_v2, %v611_v55 }
 0x228   : > { %388 = vperm.xlu1 %603, %v380_v3   ;;  %383 = vperm.xlu0 %602, %v379_v4  }
 0x2a7   : > { %v389_v8 = vpop.permute.xlu1 %388  ;;  %v384_v9 = vpop.permute.xlu0 %383 }
 0x2a8   : > { %v392_v10 = vmul.f32 %v389_v8, %v327_v33  ;;  %v391_v11 = vmul.f32 %v384_v9, %v793_v28 }
 0x2aa   : > { %v394_v12 = vsel %vm287_vm1, %v392_v10, 0.0  ;;  %v393_v13 = vsel %vm283_vm0, %v391_v11, 0.0 }
 0x2ab   : > { %v395_v14 = vadd.f32 %v394_v12, %v393_v13 }
 0x2ad   : > { %v396_v15 = vrot.slane %v395_v14, 4 }
 0x2af   : > { %v397_v16 = vadd.f32 %v396_v15, %v395_v14 }
 0x2b1   : > { %v398_v17 = vrot.slane %v397_v16, 2 }
 0x2b3   : > { %v399_v18 = vadd.f32 %v398_v17, %v397_v16 }
 0x2b5   : > { %v400_v19 = vrot.slane %v399_v18, 1 }
 0x2b7   : > { %v401_v20 = vadd.f32 %v400_v19, %v399_v18 }
 0x2b9   : > { %v402_v21 = vpack.c.bf16 %v401_v20, %v401_v20 }
 0x2bb   : > { %557 = vmatmul.mubr.msk.bf16.vlgmr.msra.gmra.mrb[0].mxu0 %vm283_vm0, %v402_v21 }
 0x38e   : > { %v457_v23 = vpop.f32.mrb[0].mxu0 }
 0x38f   : > { %v458_v24 = vadd.f32 %v457_v23, %v407_v22  ;;  %v558_v25 = vpop.f32.mrb[1].mxu0 }
 0x390   : > { %v460_v26 = vpop.f32.mrb[2].mxu0 }
 0x391   : > { %463 = vst [vmem:[%s272_s18] sm:$0x1] %v458_v24  ;;  %v559_v27 = vpop.f32.mrb[3].mxu0 }
 0x392   : > { %629 = shalt.err (!%p626_p3)
}
 0x393   : > { %s630_s9 = scalar_lea.hbm %s820_s22, 16  ;;  %s634_s15 = scalar_lea.hbm %s869_s7, 32 }
 0x394   : > { %p631_p4 = scmp.ne.s32.totalorder %s820_s22, %s630_s9  ;;  %p635_p9 = scmp.lt.u32.totalorder %s820_s22, %s869_s7 }
 0x395   : > { %p636_p10 = scmp.lt.u32.totalorder %s634_s15, %s630_s9  ;;  %p638_p12 = scmp.lt.u32.totalorder %s630_s9, %s820_s22 }
 0x396   : > { %p632_p7 = pnand %p631_p4, %p765_p5 }
 0x397   : > { %p637_p11 = por %p636_p10, %p635_p9 }
 0x398   : > { %p633_p8 = pneg %p632_p7 }
 0x399   : > { %p639_p13 = por %p638_p12, %p637_p11 }
 0x39b   : > { %p640_p0 = pnand %p639_p13, %p633_p8 }
 0x39d   : > { %643 = shalt.err (!%p640_p0)
}
 0x39e   : > { %560 = dma.vmem_to_hbm [thread:$0]  (%p765_p5), %s822_s19, 16, %s820_s22, %s465_s23  }
 0x39f PF: > { %p566_p1 = scmp.ge.s32.totalorder %s678_s29, 2  ;;  %s489_s18 = sand.u32 1, %s666_s26  }
 0x3a0   : > { %s490_s20 = scalar_lea.sflag [#allocation4], %s489_s18 }
 0x3a1   : > { %p563_p2 = pnand %p566_p1, %p769_p6 }
 0x3a3   : > { %661 = dma.done.wait (!%p563_p2), %s490_s20, 16  }
 0x3a4   : > { %663 = vsyncadd (!%p563_p2), %s490_s20, 4294967280  ;;  %p19_p3 = scmp.ge.s32.totalorder %s752_s8, 4   ;;  %s872_s26 = smov %s670_s27 }
 0x3a5   : > { %s873_s27 = smov %s674_s28  ;;  %s874_s28 = smov %s763_s11 }
 0x3a6   : > { %s875_s29 = smov %s752_s8  ;;  %21 = sbr.rel (!%p19_p3) target bundleno = 6 (0x6), region = 83 }
 0x3ad   :  { %494 = vsyncpa [#allocation4], 1 }
 0x3ae   :  { %496 = vsyncpa [#allocation4 + $0x1], 1 }

// kernel: memory_cvt_forward.5
= control target key start
LH: loop header
LB: loop body
LE: loop exit
PB: predicated region body
PF: predicated region fallthrough
CT: control target
= control target key end

     0   :  { %s1792_s25 = smov 0   ;;  %s2007_s0 = inlined_call_operand.vmem [shape: f32[2,9,32], index: 0, kind: input, shape index: {}]   ;;  %s2008_s1 = inlined_call_operand.vmem [shape: f32[1,32], index: 1, kind: input, shape index: {}]   ;;  %s2009_s2 = inlined_call_operand.vmem [shape: f32[1,32], index: 2, kind: input, shape index: {}]   ;;  %s2010_s3 = inlined_call_operand.vmem [shape: bf16[32,96], index: 3, kind: input, shape index: {}]   ;;  %s2011_s4 = inlined_call_operand.vmem [shape: f32[1,96], index: 4, kind: input, shape index: {}]   ;;  %s2012_s5 = inlined_call_operand.vmem [shape: bf16[32,32], index: 5, kind: input, shape index: {}]   ;;  %s2013_s6 = inlined_call_operand.vmem [shape: f32[1,32], index: 6, kind: input, shape index: {}]   ;;  %s2014_s7 = inlined_call_operand.vmem [shape: f32[1,32], index: 7, kind: input, shape index: {}]   ;;  %s2015_s8 = inlined_call_operand.vmem [shape: f32[1,32], index: 8, kind: input, shape index: {}]   ;;  %s2016_s9 = inlined_call_operand.vmem [shape: bf16[32,64], index: 9, kind: input, shape index: {}]   ;;  %s2017_s10 = inlined_call_operand.vmem [shape: f32[1,64], index: 10, kind: input, shape index: {}]   ;;  %s2018_s11 = inlined_call_operand.vmem [shape: bf16[64,32], index: 11, kind: input, shape index: {}]   ;;  %s2019_s12 = inlined_call_operand.vmem [shape: f32[1,32], index: 12, kind: input, shape index: {}]   ;;  %s2020_s13 = inlined_call_operand.vmem [shape: f32[2,9,32], index: 13, kind: output, shape index: {}]  }
   0x1 LB: > { %s1446_s26 = sadd.s32 4294967295, %s1703_s25   ;;  %p1450_p0 = scmp.ge.s32.totalorder %s1703_s25, 1  ;;  %s1703_s25 = sphi %s1792_s25, %s23_s25  }
   0x2   : > { %p387_p1 = scmp.lt.s32.totalorder %s1703_s25, 3 }
   0x4   : > { %p388_p2 = pnand %p1450_p0, %p387_p1 }
   0x5   : > { %p431_p3 = scmp.lt.s32.totalorder (!%p388_p2), %s1446_s26, 1  ;;  %vm446_vm0 = vcmask (!%p388_p2), 261120   ;;  %vm450_vm1 = vcmask (!%p388_p2), 253952   ;;  %v1643_v14 = vld [vmem:[%s2010_s3] sm:$0xff] (!%p388_p2)   ;;  %v1705_v15 = vmov (!%p388_p2), 0.0   ;;  %v1644_v16 = vld [vmem:[%s2010_s3 + $0x8] sm:$0xff] (!%p388_p2)  }
   0x6   : > { %391 = sbr.rel (%p388_p2) target bundleno = 2578 (0xa12), region = 72  ;;  %1519 = vmatprep.subr.bf16.mxu0 (!%p388_p2), %v1705_v15  ;;  %1527 = vmatprep.subr.bf16.mxu1 (!%p388_p2), %v1705_v15  ;;  %vm1706_vm2 = vmmov (!%p388_p2), 0   ;;  %v1455_v25 = vld [vmem:[%s2008_s1] ss:$0 sm:$0xff] (!%p388_p2)  ;;  %s1707_s24 = smov (!%p388_p2), 88   ;;  %vm563_vm3 = vcmask (!%p388_p2), 64512  }
   0x7   : > { %1520 = vmatpush3.bf16.msra.mxu0 (!%p388_p2), %v1643_v14  ;;  %1523 = vmatprep.mubr.msk.bf16.mxu0 (!%p388_p2), %vm1706_vm2, %v1705_v15  ;;  %v1456_v29 = vld [vmem:[%s2009_s2] ss:$0 sm:$0xff] (!%p388_p2)  ;;  %s1708_s28 = smov (!%p388_p2), 96   ;;  %s1709_s29 = smov (!%p388_p2), 120   ;;  %vm613_vm4 = vcmask (!%p388_p2), 72704   ;;  %vm617_vm5 = vcmask (!%p388_p2), 65536  }
   0x8   : > { %1521 = vmatprep.subr.bf16.mxu0 (!%p388_p2), %v1705_v15  ;;  %1529 = vmatprep.mubr.msk.bf16.mxu1 (!%p388_p2), %vm1706_vm2, %v1705_v15  ;;  %v1457_v34 = vld [vmem:[%s2011_s4] ss:$0 sm:$0xff] (!%p388_p2)  ;;  %s1711_s14 = smov (!%p388_p2), 80   ;;  %s1712_s15 = smov (!%p388_p2), 104   ;;  %vm643_vm6 = vcmask (!%p388_p2), 1043456   ;;  %vm644_vm7 = vcmask (!%p388_p2), 1044480  }
   0x9   : > { %s1713_s16 = smov (!%p388_p2), 72   ;;  %s1714_s17 = smov (!%p388_p2), 64   ;;  %vm1092_vm8 = vcmask (!%p388_p2), 130048   ;;  %vm1095_vm9 = vcmask (!%p388_p2), 195584   ;;  %vm1333_vm10 = vcmask (!%p388_p2), 523264  }
   0xa   : > { %s1716_s18 = smov (!%p388_p2), 48   ;;  %s1717_s19 = smov (!%p388_p2), 40  }
   0xb   : > { %1522 = vmatpush3.bf16.msra.mxu0 (!%p388_p2), %v1644_v16  ;;  %s1718_s20 = smov (!%p388_p2), 56   ;;  %s1719_s23 = smov (!%p388_p2), 8  }
   0xc   : > { %1533 = vmatprep.subr.bf16.mxu0 (!%p388_p2), %v1705_v15 }
   0xd   : > { %s2022_s26 = smov (!%p431_p3, %s1446_s26), 1 }
   0xe   : > { %s1487_s27 = sshll.u32 %s2022_s26, 4 }
   0xf   : > { %s435_s30 = scalar_lea.vmem %s2007_s0, %s1487_s27 }
  0x10   : > { %v1808_v0 = vld [vmem:[%s435_s30] sm:$0xff]  ;;  %v1810_v1 = vld [vmem:[%s435_s30 + $0x8] sm:$0x1]  ;;  %s1710_s30 = smov 112  }
  0x11   : > { %v447_v2 = vsel %vm446_vm0, %v1808_v0, 0.0  ;;  %v451_v3 = vsel %vm450_vm1, %v1810_v1, 0.0 }
  0x12   : > { %448 = vadd.xlane.f32.xlu0 %v447_v2 }
  0x16   : > { %452 = vadd.xlane.f32.xlu0 %v451_v3 }
  0x9f   : > { %v449_v4 = vpop.xlane.xlu0 %448 }
  0xa0   : > { %v455_v5 = vmul.f32 0.03125, %v449_v4 }
  0xa2   : > { %v457_v6 = vsub.f32 %v1808_v0, %v455_v5 }
  0xa3   : > { %v453_v7 = vpop.xlane.xlu0 %452 }
  0xa4   : > { %v456_v8 = vmul.f32 0.03125, %v453_v7  ;;  %v459_v9 = vmul.f32 %v457_v6, %v457_v6 }
  0xa6   : > { %v458_v10 = vsub.f32 %v1810_v1, %v456_v8  ;;  %v461_v11 = vsel %vm446_vm0, %v459_v9, 0.0 }
  0xa7   : > { %462 = vadd.xlane.f32.xlu1 %v461_v11 }
  0xa8   : > { %v460_v12 = vmul.f32 %v458_v10, %v458_v10 }
  0xaa   : > { %v464_v13 = vsel %vm450_vm1, %v460_v12, 0.0 }
  0xab   : > { %465 = vadd.xlane.f32.xlu1 %v464_v13 }
 0x134   : > { %v463_v17 = vpop.xlane.xlu1 %462 }
 0x135   : > { %v467_v18 = vmul.f32 0.03125, %v463_v17 }
 0x137   : > { %v469_v19 = vadd.f32 1e-05, %v467_v18 }
 0x138   : > { %v466_v20 = vpop.xlane.xlu1 %465 }
 0x139   : > { %1653 = vrsqrt.f32 %v469_v19  ;;  %v468_v21 = vmul.f32 0.03125, %v466_v20 }
 0x13b   : > { %v470_v22 = vadd.f32 1e-05, %v468_v21 }
 0x13d   : > { %1655 = vrsqrt.f32 %v470_v22 }
 0x143   : > { %v1654_v23 = vpop.eup %1653 }
 0x144   : > { %v473_v24 = vmul.f32 %v1654_v23, %v457_v6 }
 0x146   : > { %v481_v28 = vmul.f32 %v1455_v25, %v473_v24 }
 0x147   : > { %v1656_v26 = vpop.eup %1655 }
 0x148   : > { %v474_v27 = vmul.f32 %v1656_v26, %v458_v10  ;;  %v489_v31 = vadd.f32 %v1456_v29, %v481_v28 }
 0x14a   : > { %v482_v30 = vmul.f32 %v1455_v25, %v474_v27 }
 0x14c   : > { %v490_v32 = vadd.f32 %v1456_v29, %v482_v30 }
 0x14e   : > { %v491_v33 = vpack.c.bf16 %v490_v32, %v489_v31 }
 0x150   : > { %1524 = vmatmul.mubr.msk.bf16.vlgmr.msra.gmra.mrb[0].mxu0 %vm446_vm0, %v491_v33 }
 0x151   : > { %1535 = vmatprep.mubr.msk.bf16.mxu0 %vm1706_vm2, %v1705_v15 }
 0x223   : > { %v552_v35 = vpop.f32.mrb[0].mxu0 }
 0x224   : > { %v1525_v36 = vpop.f32.mrb[1].mxu0  ;;  %v553_v38 = vadd.f32 %v1457_v34, %v552_v35 }
 0x225   : > { %v555_v37 = vpop.f32.mrb[2].mxu0 }
 0x226   : > { %v556_v39 = vadd.f32 %v1457_v34, %v555_v37  ;;  %v1526_v40 = vpop.f32.mrb[3].mxu0 }
 0x228   : > { %v1846_v41 = vpack.c.bf16 %v556_v39, %v553_v38 }
 0x22a   : > { %693 = vrot.lane.b32.xlu1 %v1846_v41, %s1707_s24  ;;  %561 = vrot.lane.b32.xlu0 %v1846_v41, %s1708_s28  ;;  %s440_s24 = scalar_lea.vmem %s2020_s13, %s1487_s27 }
 0x22e   : > { %691 = vrot.lane.b32.xlu1 %v1846_v41, %s1709_s29  ;;  %816 = vrot.lane.b32.xlu0 %v1846_v41, %s1710_s30  ;;  %s1720_s29 = smov 16   ;;  %s1721_s30 = smov 24  }
 0x232   : > { %818 = vrot.lane.b32.xlu1 %v1846_v41, %s1711_s14  ;;  %941 = vrot.lane.b32.xlu0 %v1846_v41, %s1712_s15 }
 0x236   : > { %943 = vrot.lane.b32.xlu1 %v1846_v41, %s1713_s16 }
 0x29c   : > { %v562_v42 = vpop.permute.xlu0 %561  ;;  %v694_v44 = vpop.permute.xlu1 %693 }
 0x29d   : > { %v568_v43 = vsel %vm563_vm3, %v562_v42, 0  ;;  %v699_v46 = vsel %vm563_vm3, %v694_v44, 0 }
 0x29e   : > { %1528 = vmatpush3.bf16.xpose.msra.mxu1 %v568_v43 }
 0x29f   : > { %1539 = vmatprep.subr.bf16.mxu1 %v1705_v15 }
 0x2a0   : > { %v692_v45 = vpop.permute.xlu1 %691  ;;  %v817_v50 = vpop.permute.xlu0 %816 }
 0x2a4   : > { %v819_v47 = vpop.permute.xlu1 %818  ;;  %v942_v52 = vpop.permute.xlu0 %941 }
 0x2a5   : > { %1530 = vmatmul.mubr.msk.bf16.vlgmr.msra.gmra.mrb[0].mxu1 %vm563_vm3, %v1846_v41  ;;  %v824_v48 = vsel %vm563_vm3, %v819_v47, 0 }
 0x2a6   : > { %1540 = vmatpush3.bf16.xpose.msra.mxu1 %v699_v46  ;;  %1541 = vmatprep.mubr.msk.bf16.mxu1 %vm1706_vm2, %v1705_v15 }
 0x2a7   : > { %1551 = vmatprep.subr.bf16.mxu1 %v1705_v15 }
 0x2a8   : > { %v944_v49 = vpop.permute.xlu1 %943 }
 0x2a9   : > { %v949_v51 = vsel %vm563_vm3, %v944_v49, 0 }
 0x2ad   : > { %1542 = vmatmul.mubr.msk.bf16.vlgmr.msra.gmra.mrb[4].mxu1 %vm563_vm3, %v692_v45 }
 0x2ae   : > { %1552 = vmatpush3.bf16.xpose.msra.mxu1 %v824_v48  ;;  %1553 = vmatprep.mubr.msk.bf16.mxu1 %vm1706_vm2, %v1705_v15  ;;  %v1715_v48 = vmov 65535  }
 0x2af   : > { %1563 = vmatprep.subr.bf16.mxu1 %v1705_v15  ;;  %v645_v49 = vsel %vm643_vm6, 4294967295, %v1715_v48 }
 0x2b5   : > { %1554 = vmatmul.mubr.msk.bf16.vlgmr.msra.gmra.mrb[8].mxu1 %vm563_vm3, %v817_v50 }
 0x2b6   : > { %1564 = vmatpush3.bf16.xpose.msra.mxu1 %v949_v51  ;;  %1565 = vmatprep.mubr.msk.bf16.mxu1 %vm1706_vm2, %v1705_v15 }
 0x2b7   : > { %1575 = vmatprep.subr.bf16.mxu1 %v1705_v15 }
 0x2bd   : > { %1566 = vmatmul.mubr.msk.bf16.vlgmr.msra.gmra.mrb[12].mxu1 %vm563_vm3, %v942_v52 }
 0x2be   : > { %1579 = vmatprep.mubr.msk.bf16.mxu1 %vm1706_vm2, %v1705_v15 }
 0x378   : > { %v604_v53 = vpop.f32.mrb[0].mxu1 }
 0x379   : > { %v611_v54 = vmul.f32 0.35355338, %v604_v53  ;;  %v1531_v55 = vpop.f32.mrb[1].mxu1 }
 0x37a   : > { %v607_v56 = vpop.f32.mrb[2].mxu1 }
 0x37b   : > { %v612_v57 = vmul.f32 0.35355338, %v607_v56  ;;  %v1532_v58 = vpop.f32.mrb[3].mxu1  ;;  %v614_v59 = vsel %vm613_vm4, %v611_v54, -inf }
 0x37c   : > { %615 = vmax.xlane.f32.xlu1 %v614_v59 }
 0x37d   : > { %v618_v60 = vsel %vm617_vm5, %v612_v57, -inf }
 0x37e   : > { %619 = vmax.xlane.f32.xlu0 %v618_v60 }
 0x380   : > { %v735_v61 = vpop.f32.mrb[4].mxu1 }
 0x381   : > { %v742_v62 = vmul.f32 0.35355338, %v735_v61  ;;  %v1543_v63 = vpop.f32.mrb[5].mxu1 }
 0x382   : > { %v738_v2 = vpop.f32.mrb[6].mxu1 }
 0x383   : > { %v743_v3 = vmul.f32 0.35355338, %v738_v2  ;;  %v1544_v4 = vpop.f32.mrb[7].mxu1  ;;  %v744_v5 = vsel %vm613_vm4, %v742_v62, -inf }
 0x384   : > { %745 = vmax.xlane.f32.xlu0 %v744_v5 }
 0x385   : > { %v747_v6 = vsel %vm617_vm5, %v743_v3, -inf }
 0x388   : > { %748 = vmax.xlane.f32.xlu0 %v747_v6  ;;  %v860_v7 = vpop.f32.mrb[8].mxu1 }
 0x389   : > { %v867_v8 = vmul.f32 0.35355338, %v860_v7  ;;  %v1555_v9 = vpop.f32.mrb[9].mxu1 }
 0x38a   : > { %v863_v10 = vpop.f32.mrb[10].mxu1 }
 0x38b   : > { %v868_v11 = vmul.f32 0.35355338, %v863_v10  ;;  %v1556_v12 = vpop.f32.mrb[11].mxu1  ;;  %v869_v13 = vsel %vm613_vm4, %v867_v8, -inf }
 0x38c   : > { %870 = vmax.xlane.f32.xlu1 %v869_v13 }
 0x38d   : > { %v872_v14 = vsel %vm617_vm5, %v868_v11, -inf }
 0x38e   : > { %873 = vmax.xlane.f32.xlu0 %v872_v14 }
 0x390   : > { %v985_v16 = vpop.f32.mrb[12].mxu1 }
 0x391   : > { %v992_v17 = vmul.f32 0.35355338, %v985_v16  ;;  %v1567_v18 = vpop.f32.mrb[13].mxu1 }
 0x392   : > { %v988_v19 = vpop.f32.mrb[14].mxu1 }
 0x393   : > { %v993_v20 = vmul.f32 0.35355338, %v988_v19  ;;  %v1568_v21 = vpop.f32.mrb[15].mxu1  ;;  %v994_v22 = vsel %vm613_vm4, %v992_v17, -inf }
 0x394   : > { %995 = vmax.xlane.f32.xlu1 %v994_v22 }
 0x395   : > { %v997_v23 = vsel %vm617_vm5, %v993_v20, -inf }
 0x396   : > { %998 = vmax.xlane.f32.xlu0 %v997_v23 }
 0x3a5   : > { %638 = vrot.lane.b32.xlu1 %v1846_v41, %s1714_s17 }
 0x409   : > { %v616_v24 = vpop.xlane.xlu1 %615 }
 0x40a   : > { %v621_v25 = vsub.f32 %v611_v54, %v616_v24  ;;  %v1894_v54 = vsel %vm644_vm7, %v645_v49, 0 }
 0x40b   : > { %v620_v26 = vpop.xlane.xlu0 %619 }
 0x40c   : > { %v623_v27 = vmul.f32 1.442695, %v621_v25  ;;  %v622_v28 = vsub.f32 %v612_v57, %v620_v26 }
 0x40e   : > { %1657 = vpow2.f32 %v623_v27  ;;  %v625_v29 = vmul.f32 1.442695, %v622_v28 }
 0x410   : > { %1659 = vpow2.f32 %v625_v29 }
 0x411   : > { %v746_v30 = vpop.xlane.xlu0 %745 }
 0x412   : > { %v750_v31 = vsub.f32 %v742_v62, %v746_v30 }
 0x414   : > { %v752_v32 = vmul.f32 1.442695, %v750_v31 }
 0x415   : > { %v749_v33 = vpop.xlane.xlu0 %748 }
 0x416   : > { %1661 = vpow2.f32 %v752_v32  ;;  %v751_v34 = vsub.f32 %v743_v3, %v749_v33 }
 0x418   : > { %v1885_v35 = vpop.eup %1657  ;;  %v754_v36 = vmul.f32 1.442695, %v751_v34 }
 0x419   : > { %v871_v37 = vpop.xlane.xlu1 %870  ;;  %v627_v38 = vsel %vm613_vm4, %v1885_v35, 0.0 }
 0x41a   : > { %v1660_v39 = vpop.eup %1659  ;;  %1663 = vpow2.f32 %v754_v36  ;;  %v875_v40 = vsub.f32 %v867_v8, %v871_v37  ;;  %628 = vadd.xlane.f32.xlu1 %v627_v38 }
 0x41b   : > { %v874_v42 = vpop.xlane.xlu0 %873  ;;  %v630_v43 = vsel %vm617_vm5, %v1660_v39, 0.0 }
 0x41c   : > { %v877_v44 = vmul.f32 1.442695, %v875_v40  ;;  %v876_v45 = vsub.f32 %v868_v11, %v874_v42  ;;  %631 = vadd.xlane.f32.xlu0 %v630_v43 }
 0x41e   : > { %1665 = vpow2.f32 %v877_v44  ;;  %v879_v46 = vmul.f32 1.442695, %v876_v45 }
 0x420   : > { %v1890_v47 = vpop.eup %1661  ;;  %1667 = vpow2.f32 %v879_v46 }
 0x421   : > { %v996_v50 = vpop.xlane.xlu1 %995  ;;  %v756_v51 = vsel %vm613_vm4, %v1890_v47, 0.0 }
 0x422   : > { %v1000_v52 = vsub.f32 %v992_v17, %v996_v50  ;;  %757 = vadd.xlane.f32.xlu1 %v756_v51  ;;  %v1645_v50 = vld [vmem:[%s2012_s5] sm:$0xff]  }
 0x423   : > { %v999_v53 = vpop.xlane.xlu0 %998  ;;  %1576 = vmatpush3.bf16.msra.mxu1 %v1645_v50 }
 0x424   : > { %v1664_v55 = vpop.eup %1663  ;;  %v1002_v56 = vmul.f32 1.442695, %v1000_v52  ;;  %v1001_v57 = vsub.f32 %v993_v20, %v999_v53  ;;  %1577 = vmatprep.subr.bf16.mxu1 %v1705_v15 }
 0x425   : > { %v639_v58 = vpop.permute.xlu1 %638  ;;  %v759_v59 = vsel %vm617_vm5, %v1664_v55, 0.0 }
 0x426   : > { %1669 = vpow2.f32 %v1002_v56  ;;  %v1004_v60 = vmul.f32 1.442695, %v1001_v57  ;;  %v648_v61 = vand.u32 %v1894_v54, %v639_v58  ;;  %760 = vadd.xlane.f32.xlu0 %v759_v59 }
 0x428   : > { %v1666_v62 = vpop.eup %1665  ;;  %1671 = vpow2.f32 %v1004_v60  ;;  %1534 = vmatpush3.bf16.msra.mxu0 %v648_v61 }
 0x429   : > { %v881_v63 = vsel %vm613_vm4, %v1666_v62, 0.0  ;;  %1545 = vmatprep.subr.bf16.mxu0 %v1705_v15 }
 0x42a   : > { %v1668_v2 = vpop.eup %1667  ;;  %882 = vadd.xlane.f32.xlu1 %v881_v63 }
 0x42b   : > { %v884_v3 = vsel %vm617_vm5, %v1668_v2, 0.0 }
 0x42c   : > { %885 = vadd.xlane.f32.xlu0 %v884_v3 }
 0x430   : > { %v1901_v4 = vpop.eup %1669 }
 0x431   : > { %v1006_v5 = vsel %vm613_vm4, %v1901_v4, 0.0 }
 0x432   : > { %v1672_v6 = vpop.eup %1671  ;;  %1007 = vadd.xlane.f32.xlu0 %v1006_v5 }
 0x433   : > { %v1009_v7 = vsel %vm617_vm5, %v1672_v6, 0.0 }
 0x436   : > { %1010 = vadd.xlane.f32.xlu0 %v1009_v7 }
 0x43b   : > { %892 = vrot.lane.b32.xlu1 %v1846_v41, %s1716_s18 }
 0x43f   : > { %1017 = vrot.lane.b32.xlu1 %v1846_v41, %s1717_s19 }
 0x44c   : > { %767 = vrot.lane.b32.xlu0 %v1846_v41, %s1718_s20 }
 0x4a7   : > { %v629_v8 = vpop.xlane.xlu1 %628 }
 0x4a8   : > { %1673 = vrcp.f32 %v629_v8 }
 0x4a9   : > { %v632_v9 = vpop.xlane.xlu0 %631 }
 0x4aa   : > { %1675 = vrcp.f32 %v632_v9 }
 0x4af   : > { %v758_v17 = vpop.xlane.xlu1 %757 }
 0x4b2   : > { %v1674_v10 = vpop.eup %1673 }
 0x4b3   : > { %v635_v12 = vmul.f32 %v1674_v10, %v1885_v35  ;;  %v761_v14 = vpop.xlane.xlu0 %760 }
 0x4b4   : > { %v1676_v11 = vpop.eup %1675  ;;  %1677 = vrcp.f32 %v761_v14 }
 0x4b5   : > { %v636_v13 = vmul.f32 %v1676_v11, %v1660_v39  ;;  %1679 = vrcp.f32 %v758_v17 }
 0x4b7   : > { %v637_v16 = vpack.c.bf16 %v636_v13, %v635_v12  ;;  %v883_v19 = vpop.xlane.xlu1 %882 }
 0x4b9   : > { %1536 = vmatmul.mubr.msk.bf16.vlgmr.msra.gmra.mrb[4].mxu0 %vm613_vm4, %v637_v16  ;;  %v886_v18 = vpop.xlane.xlu0 %885 }
 0x4ba   : > { %1547 = vmatprep.mubr.msk.bf16.mxu0 %vm1706_vm2, %v1705_v15  ;;  %1681 = vrcp.f32 %v886_v18 }
 0x4bb   : > { %1683 = vrcp.f32 %v883_v19  ;;  %v893_v27 = vpop.permute.xlu1 %892  ;;  %v1472_v19 = vld [vmem:[%s2013_s6] ss:$0 sm:$0xff] }
 0x4bc   : > { %v898_v30 = vand.u32 %v893_v27, %v1894_v54 }
 0x4be   : > { %v1678_v21 = vpop.eup %1677 }
 0x4bf   : > { %v1008_v41 = vpop.xlane.xlu0 %1007  ;;  %v1680_v22 = vpop.eup %1679  ;;  %v765_v23 = vmul.f32 %v1678_v21, %v1664_v55  ;;  %v1646_v55 = vld [vmem:[%s2012_s5 + $0x8] sm:$0xff]  }
 0x4c0   : > { %v764_v26 = vmul.f32 %v1680_v22, %v1890_v47  ;;  %v1018_v34 = vpop.permute.xlu1 %1017  ;;  %1578 = vmatpush3.bf16.msra.mxu1 %v1646_v55 }
 0x4c1   : > { %v1023_v37 = vand.u32 %v1018_v34, %v1894_v54  ;;  %1591 = vmatprep.subr.bf16.mxu1 %v1705_v15 }
 0x4c2   : > { %v766_v28 = vpack.c.bf16 %v765_v23, %v764_v26 }
 0x4c3   : > { %v1011_v20 = vpop.xlane.xlu0 %1010 }
 0x4c4   : > { %1685 = vrcp.f32 %v1011_v20  ;;  %v1682_v29 = vpop.eup %1681 }
 0x4c5   : > { %1687 = vrcp.f32 %v1008_v41  ;;  %v1684_v31 = vpop.eup %1683  ;;  %v890_v32 = vmul.f32 %v1682_v29, %v1668_v2 }
 0x4c6   : > { %v889_v33 = vmul.f32 %v1684_v31, %v1666_v62 }
 0x4c7   : > { %v768_v24 = vpop.permute.xlu0 %767 }
 0x4c8   : > { %v773_v25 = vand.u32 %v768_v24, %v1894_v54  ;;  %v891_v35 = vpack.c.bf16 %v890_v32, %v889_v33 }
 0x4ca   : > { %1546 = vmatpush3.bf16.msra.mxu0 %v773_v25 }
 0x4cb   : > { %1557 = vmatprep.subr.bf16.mxu0 %v1705_v15 }
 0x4cd   : > { %1548 = vmatmul.mubr.msk.bf16.vlgmr.msra.gmra.mrb[8].mxu0 %vm613_vm4, %v766_v28 }
 0x4ce   : > { %1558 = vmatpush3.bf16.msra.mxu0 %v898_v30  ;;  %1559 = vmatprep.mubr.msk.bf16.mxu0 %vm1706_vm2, %v1705_v15  ;;  %v1686_v36 = vpop.eup %1685 }
 0x4cf   : > { %1569 = vmatprep.subr.bf16.mxu0 %v1705_v15  ;;  %v1688_v38 = vpop.eup %1687  ;;  %v1015_v39 = vmul.f32 %v1686_v36, %v1672_v6 }
 0x4d0   : > { %v1014_v40 = vmul.f32 %v1688_v38, %v1901_v4  ;;  %v1648_v38 = vld [vmem:[%s2016_s9 + $0x8] sm:$0xff]  }
 0x4d2   : > { %v1016_v42 = vpack.c.bf16 %v1015_v39, %v1014_v40 }
 0x4d5   : > { %1560 = vmatmul.mubr.msk.bf16.vlgmr.msra.gmra.mrb[12].mxu0 %vm613_vm4, %v891_v35 }
 0x4d6   : > { %1570 = vmatpush3.bf16.msra.mxu0 %v1023_v37  ;;  %1571 = vmatprep.mubr.msk.bf16.mxu0 %vm1706_vm2, %v1705_v15  ;;  %v1647_v37 = vld [vmem:[%s2016_s9] sm:$0xff]  }
 0x4d7   : > { %1583 = vmatprep.subr.bf16.mxu0 %v1705_v15 }
 0x4dd   : > { %1572 = vmatmul.mubr.msk.bf16.vlgmr.msra.gmra.mrb[16].mxu0 %vm613_vm4, %v1016_v42 }
 0x4de   : > { %1587 = vmatprep.mubr.msk.bf16.mxu0 %vm1706_vm2, %v1705_v15  ;;  %1584 = vmatpush3.bf16.msra.mxu0 %v1647_v37 }
 0x4df   : > { %1585 = vmatprep.subr.bf16.mxu0 %v1705_v15 }
 0x4e2   : > { %1586 = vmatpush3.bf16.msra.mxu0 %v1648_v38 }
 0x58c   : > { %v684_v43 = vpop.f32.mrb[4].mxu0 }
 0x58d   : > { %v1537_v44 = vpop.f32.mrb[5].mxu0 }
 0x58e   : > { %v687_v45 = vpop.f32.mrb[6].mxu0 }
 0x58f   : > { %v1538_v46 = vpop.f32.mrb[7].mxu0 }
 0x5a0   : > { %v809_v47 = vpop.f32.mrb[8].mxu0 }
 0x5a1   : > { %v1549_v48 = vpop.f32.mrb[9].mxu0 }
 0x5a2   : > { %v812_v49 = vpop.f32.mrb[10].mxu0  ;;  %v1473_v48 = vld [vmem:[%s2014_s7] ss:$0 sm:$0xff] }
 0x5a3   : > { %v1628_v51 = vpack.i.bf16 %v812_v49, %v809_v47  ;;  %v1550_v52 = vpop.f32.mrb[11].mxu0 }
 0x5a4   : > { %v1474_v52 = vld [vmem:[%s2015_s8] ss:$0 sm:$0xff] }
 0x5a5   : > { %1629 = vrot.lane.b32.xlu1 %v1628_v51, %s1719_s23 }
 0x5a8   : > { %v934_v53 = vpop.f32.mrb[12].mxu0 }
 0x5a9   : > { %v1561_v54 = vpop.f32.mrb[13].mxu0 }
 0x5aa   : > { %v937_v56 = vpop.f32.mrb[14].mxu0 }
 0x5ab   : > { %v1633_v57 = vpack.i.bf16 %v937_v56, %v934_v53  ;;  %v1562_v58 = vpop.f32.mrb[15].mxu0 }
 0x5ac   : > { %v1650_v58 = vld [vmem:[%s2018_s11 + $0x8] sm:$0xff]  }
 0x5ad   : > { %1634 = vrot.lane.b32.xlu1 %v1633_v57, %s1720_s29  ;;  %v1649_v57 = vld [vmem:[%s2018_s11] sm:$0xff]  }
 0x5b0   : > { %v1059_v59 = vpop.f32.mrb[16].mxu0 }
 0x5b1   : > { %v1573_v60 = vpop.f32.mrb[17].mxu0 }
 0x5b2   : > { %v1062_v61 = vpop.f32.mrb[18].mxu0  ;;  %v1652_v60 = vld [vmem:[%s2018_s11 + $0x18] sm:$0xff]  }
 0x5b3   : > { %v1638_v62 = vpack.i.bf16 %v1062_v61, %v1059_v59  ;;  %v1574_v63 = vpop.f32.mrb[19].mxu0  ;;  %v1651_v59 = vld [vmem:[%s2018_s11 + $0x10] sm:$0xff]   ;;  %v1475_v61 = vld [vmem:[%s2017_s10] ss:$0 sm:$0xff] }
 0x5b5   : > { %1639 = vrot.lane.b32.xlu1 %v1638_v62, %s1721_s30 }
 0x617   : > { %v1630_v2 = vpop.permute.xlu1 %1629 }
 0x618   : > { %v1632_v4 = vunpack.i.h.bf16 %v1630_v2  ;;  %v1631_v5 = vunpack.i.l.bf16 %v1630_v2 }
 0x61a   : > { %v1091_v9 = vsel %vm563_vm3, %v687_v45, %v1632_v4  ;;  %v1090_v10 = vsel %vm563_vm3, %v684_v43, %v1631_v5 }
 0x61f   : > { %v1635_v3 = vpop.permute.xlu1 %1634 }
 0x620   : > { %v1637_v6 = vunpack.i.h.bf16 %v1635_v3  ;;  %v1636_v7 = vunpack.i.l.bf16 %v1635_v3 }
 0x622   : > { %v1094_v13 = vsel %vm1092_vm8, %v1091_v9, %v1637_v6  ;;  %v1093_v14 = vsel %vm1092_vm8, %v1090_v10, %v1636_v7 }
 0x627   : > { %v1640_v8 = vpop.permute.xlu1 %1639 }
 0x628   : > { %v1642_v11 = vunpack.i.h.bf16 %v1640_v8  ;;  %v1641_v12 = vunpack.i.l.bf16 %v1640_v8 }
 0x62a   : > { %v1097_v16 = vsel %vm1095_vm9, %v1094_v13, %v1642_v11  ;;  %v1096_v17 = vsel %vm1095_vm9, %v1093_v14, %v1641_v12 }
 0x62b   : > { %v1098_v18 = vpack.c.bf16 %v1097_v16, %v1096_v17 }
 0x62d   : > { %1580 = vmatmul.mubr.msk.bf16.vlgmr.msra.gmra.mrb[16].mxu1 %vm446_vm0, %v1098_v18 }
 0x62e   : > { %1599 = vmatprep.mubr.msk.bf16.mxu1 %vm1706_vm2, %v1705_v15  ;;  %1592 = vmatpush3.bf16.msra.mxu1 %v1649_v57 }
 0x62f   : > { %1593 = vmatprep.subr.bf16.mxu1 %v1705_v15 }
 0x632   : > { %1594 = vmatpush3.bf16.msra.mxu1 %v1650_v58 }
 0x633   : > { %1595 = vmatprep.subr.bf16.mxu1 %v1705_v15 }
 0x636   : > { %1596 = vmatpush3.bf16.msra.mxu1 %v1651_v59 }
 0x637   : > { %1597 = vmatprep.subr.bf16.mxu1 %v1705_v15 }
 0x63a   : > { %1598 = vmatpush3.bf16.msra.mxu1 %v1652_v60 }
 0x700   : > { %v1152_v41 = vpop.f32.mrb[16].mxu1 }
 0x701   : > { %v1159_v20 = vadd.f32 %v1152_v41, %v1808_v0  ;;  %v1581_v21 = vpop.f32.mrb[17].mxu1 }
 0x702   : > { %v1155_v22 = vpop.f32.mrb[18].mxu1 }
 0x703   : > { %v1947_v23 = vadd.f32 %v1472_v19, %v1159_v20  ;;  %v1160_v24 = vadd.f32 %v1155_v22, %v1810_v1  ;;  %v1582_v25 = vpop.f32.mrb[19].mxu1 }
 0x705   : > { %v1950_v26 = vadd.f32 %v1472_v19, %v1160_v24  ;;  %v1172_v27 = vsel %vm446_vm0, %v1947_v23, 0.0 }
 0x706   : > { %1173 = vadd.xlane.f32.xlu0 %v1172_v27  ;;  %v1484_v27 = vld [vmem:[%s2019_s12] ss:$0 sm:$0xff] }
 0x707   : > { %v1175_v28 = vsel %vm450_vm1, %v1950_v26, 0.0 }
 0x708   : > { %1176 = vadd.xlane.f32.xlu1 %v1175_v28 }
 0x793   : > { %v1174_v29 = vpop.xlane.xlu0 %1173 }
 0x794   : > { %v1178_v30 = vmul.f32 0.03125, %v1174_v29 }
 0x795   : > { %v1177_v0 = vpop.xlane.xlu1 %1176 }
 0x796   : > { %v1180_v31 = vsub.f32 %v1947_v23, %v1178_v30  ;;  %v1179_v32 = vmul.f32 0.03125, %v1177_v0 }
 0x798   : > { %v1181_v33 = vsub.f32 %v1950_v26, %v1179_v32  ;;  %v1182_v1 = vmul.f32 %v1180_v31, %v1180_v31 }
 0x79a   : > { %v1184_v34 = vsel %vm446_vm0, %v1182_v1, 0.0  ;;  %v1183_v35 = vmul.f32 %v1181_v33, %v1181_v33 }
 0x79b   : > { %1185 = vadd.xlane.f32.xlu0 %v1184_v34 }
 0x79c   : > { %v1187_v36 = vsel %vm450_vm1, %v1183_v35, 0.0 }
 0x79f   : > { %1188 = vadd.xlane.f32.xlu0 %v1187_v36 }
 0x828   : > { %v1186_v39 = vpop.xlane.xlu0 %1185 }
 0x829   : > { %v1190_v40 = vmul.f32 0.03125, %v1186_v39 }
 0x82b   : > { %v1192_v42 = vadd.f32 1e-05, %v1190_v40 }
 0x82c   : > { %v1189_v43 = vpop.xlane.xlu0 %1188 }
 0x82d   : > { %1689 = vrsqrt.f32 %v1192_v42  ;;  %v1191_v44 = vmul.f32 0.03125, %v1189_v43 }
 0x82f   : > { %v1193_v45 = vadd.f32 1e-05, %v1191_v44 }
 0x831   : > { %1691 = vrsqrt.f32 %v1193_v45 }
 0x837   : > { %v1690_v46 = vpop.eup %1689 }
 0x838   : > { %v1196_v47 = vmul.f32 %v1690_v46, %v1180_v31 }
 0x83a   : > { %v1204_v50 = vmul.f32 %v1473_v48, %v1196_v47 }
 0x83b   : > { %v1692_v49 = vpop.eup %1691 }
 0x83c   : > { %v1197_v51 = vmul.f32 %v1692_v49, %v1181_v33  ;;  %v1212_v54 = vadd.f32 %v1474_v52, %v1204_v50 }
 0x83e   : > { %v1205_v53 = vmul.f32 %v1473_v48, %v1197_v51 }
 0x840   : > { %v1213_v55 = vadd.f32 %v1474_v52, %v1205_v53 }
 0x842   : > { %v1214_v56 = vpack.c.bf16 %v1213_v55, %v1212_v54 }
 0x844   : > { %1588 = vmatmul.mubr.msk.bf16.vlgmr.msra.gmra.mrb[20].mxu0 %vm446_vm0, %v1214_v56 }
 0x917   : > { %v1275_v62 = vpop.f32.mrb[20].mxu0 }
 0x918   : > { %v1276_v63 = vadd.f32 %v1475_v61, %v1275_v62  ;;  %v1589_v2 = vpop.f32.mrb[21].mxu0 }
 0x919   : > { %v1278_v3 = vpop.f32.mrb[22].mxu0 }
 0x91a   : > { %v1284_v4 = vmul.f32 0.044715, %v1276_v63  ;;  %v1279_v5 = vadd.f32 %v1475_v61, %v1278_v3  ;;  %v1590_v6 = vpop.f32.mrb[23].mxu0  ;;  %v1282_v41 = vmul.f32 0.5, %v1276_v63 }
 0x91c   : > { %v1286_v7 = vmul.f32 %v1284_v4, %v1276_v63  ;;  %v1285_v8 = vmul.f32 0.044715, %v1279_v5  ;;  %v1283_v19 = vmul.f32 0.5, %v1279_v5 }
 0x91e   : > { %v1288_v9 = vmul.f32 %v1286_v7, %v1276_v63  ;;  %v1287_v10 = vmul.f32 %v1285_v8, %v1279_v5 }
 0x920   : > { %v1290_v11 = vadd.f32 %v1288_v9, %v1276_v63  ;;  %v1289_v12 = vmul.f32 %v1287_v10, %v1279_v5 }
 0x922   : > { %v1292_v13 = vmul.f32 0.7978846, %v1290_v11  ;;  %v1291_v15 = vadd.f32 %v1289_v12, %v1279_v5 }
 0x924   : > { %1693 = vtanh.f32 %v1292_v13  ;;  %v1293_v14 = vmul.f32 0.7978846, %v1291_v15 }
 0x926   : > { %1695 = vtanh.f32 %v1293_v14 }
 0x92e   : > { %v1694_v16 = vpop.eup %1693 }
 0x92f   : > { %v1296_v17 = vadd.f32 1.0, %v1694_v16 }
 0x930   : > { %v1696_v18 = vpop.eup %1695 }
 0x931   : > { %v1297_v20 = vadd.f32 1.0, %v1696_v18  ;;  %v1298_v21 = vmul.f32 %v1296_v17, %v1282_v41 }
 0x933   : > { %v1299_v22 = vmul.f32 %v1297_v20, %v1283_v19 }
 0x935   : > { %v1300_v24 = vpack.c.bf16 %v1299_v22, %v1298_v21 }
 0x937   : > { %1600 = vmatmul.mubr.msk.bf16.vlgmr.msra.gmra.mrb[20].mxu1 %vm1333_vm10, %v1300_v24 }
 0xa0a   : > { %v1371_v25 = vpop.f32.mrb[20].mxu1 }
 0xa0b   : > { %v1378_v28 = vadd.f32 %v1371_v25, %v1947_v23  ;;  %v1601_v29 = vpop.f32.mrb[21].mxu1 }
 0xa0c   : > { %v1374_v30 = vpop.f32.mrb[22].mxu1 }
 0xa0d   : > { %v1387_v0 = vadd.f32 %v1484_v27, %v1378_v28  ;;  %v1379_v31 = vadd.f32 %v1374_v30, %v1950_v26  ;;  %v1602_v32 = vpop.f32.mrb[23].mxu1 }
 0xa0f   : > { %1389 = vst.msk [vmem:[%s440_s24] sm:$0xff] %vm446_vm0, %v1387_v0  ;;  %v1388_v33 = vadd.f32 %v1484_v27, %v1379_v31 }
 0xa11   : > { %1390 = vst.msk [vmem:[%s440_s24 + $0x8] sm:$0x1] %vm450_vm1, %v1388_v33 }
 0xa12 PF: > { %s23_s25 = sadd.s32 1, %s1703_s25  }
 0xa13   : > { %p20_p4 = scmp.ge.s32.totalorder %s23_s25, 4  }
 0xa15   :  { %22 = sbr.rel (!%p20_p4) target bundleno = 1 (0x1), region = 102 }

</bundles_post_ra>
